<compile_context>
chip_gen: v7x
topology: tpu7x:2x2x1
jax: 0.10.0
libtpu: 0.0.40
codegen_flags: <defaults>
</compile_context>

<pallas_src>
import functools
import math

import jax
import jax.numpy as jnp
from jax import lax
from jax.experimental import pallas as pl
from jax.experimental.pallas import tpu as pltpu


def _layernorm(x, gamma, beta, eps=1e-5):
    mean = jnp.mean(x, axis=-1, keepdims=True)
    var = jnp.mean((x - mean) ** 2, axis=-1, keepdims=True)
    inv = lax.rsqrt(var + eps)
    return (x - mean) * inv * gamma + beta


def _tpu_vmem_capacity_bytes():
    """Physical per-core VMEM; conservative (v7x) fallback if the query is unavailable."""
    try:
        info = pltpu.get_tpu_info()
        cap = getattr(info, "vmem_capacity_bytes", None)
        if cap:
            return int(cap)
    except Exception:
        pass
    return 64 * 1024 * 1024


def _choose_q_tile(S, vmem_cap_bytes):
    """Largest 16-row-aligned query tile that divides S, capped by the VMEM budget.

    bf16 packs 16 rows per vreg -> require tile % 16 == 0. Target 512 when 128 MiB VMEM
    (v5e/v6e) is available (better per-step amortization / MXU M feed), 256 under v7x's
    64 MiB budget.
    """
    target = 512 if vmem_cap_bytes > 96 * 1024 * 1024 else 256
    if S <= target:
        return S
    for t in range(target, 15, -1):
        if S % t == 0 and t % 16 == 0:
            return t
    return S


def encoder_layer_kernel(
    x_ref,
    wq_ref, bq_ref, wk_ref, bk_ref, wv_ref, bv_ref, wo_ref, bo_ref,
    g1_ref, be1_ref,
    w1_ref, bf1_ref, w2_ref, bf2_ref,
    g2_ref, be2_ref,
    o_ref,
    k_sc, v_sc,        # (H, S, dh) bf16: per-batch K/V, carried across q-tiles
    q_sc,              # (H, T, dh) bf16: per-tile head-major Q staging
    attn_sc,           # (T, D)     bf16: per-tile concatenated attention output
    *, num_heads, tile_s,
):
    S = x_ref.shape[1]
    D = x_ref.shape[2]
    H = num_heads
    dh = D // H
    scale = 1.0 / math.sqrt(dh)
    bf16 = jnp.bfloat16
    f32 = jnp.float32

    qi = pl.program_id(1)
    q_start = pl.multiple_of(qi * tile_s, tile_s)

    g1 = g1_ref[0]
    be1 = be1_ref[0]

    # ---- K/V projection: ONCE per batch (q-tile grid axis is "arbitrary") -------------
    # One lane-dense (S,D)x(D,D) MXU matmul each, then head-split into head-major scratch.
    # TODO(synk): for very large S on v7x (64 MiB VMEM), stream K/V in key tiles with an
    #             online (flash) softmax instead of keeping (H, S, dh) resident.
    @pl.when(qi == 0)
    def _():
        h_full = _layernorm(x_ref[0], g1, be1).astype(bf16)                    # (S, D)
        k = jnp.dot(h_full, wk_ref[...], preferred_element_type=f32) + bk_ref[0]
        v = jnp.dot(h_full, wv_ref[...], preferred_element_type=f32) + bv_ref[0]
        for hi in range(H):
            sl = slice(hi * dh, (hi + 1) * dh)
            k_sc[hi] = k[:, sl].astype(bf16)
            v_sc[hi] = v[:, sl].astype(bf16)

    # ---- pre-norm self-attention on this query tile ------------------------------------
    x_q = x_ref[0, pl.ds(q_start, tile_s), :]                                  # (T, D) f32
    h_q = _layernorm(x_q, g1, be1).astype(bf16)

    # 1/sqrt(dh) folded into Q once (instead of scaling the (H, T, S) scores).
    q = (jnp.dot(h_q, wq_ref[...], preferred_element_type=f32) + bq_ref[0]) * scale
    for hi in range(H):
        q_sc[hi] = q[:, hi * dh:(hi + 1) * dh].astype(bf16)                    # (T, dh)

    # Heads-batched attention: all heads in one batched contraction each (no per-head
    # matmul loop, no per-head live score blocks).
    s = jnp.einsum("hqd,hkd->hqk", q_sc[...], k_sc[...],
                   preferred_element_type=f32)                                 # (H, T, S)
    s = s - jnp.max(s, axis=-1, keepdims=True)
    p = jnp.exp(s)
    denom = jnp.sum(p, axis=-1, keepdims=True)                                 # (H, T, 1)
    o_h = jnp.einsum("hqk,hkd->hqd", p.astype(bf16), v_sc[...],
                     preferred_element_type=f32)                               # (H, T, dh)
    # Deferred softmax normalization: scale (H,T,dh) instead of (H,T,S); EUP reciprocal.
    # approx=True is fine at the test tolerance; use approx=False if exactness matters.
    o_h = (o_h * pl.reciprocal(denom, approx=True)).astype(bf16)

    for hi in range(H):
        attn_sc[:, hi * dh:(hi + 1) * dh] = o_h[hi]                            # bf16 scratch

    attn = jnp.dot(attn_sc[...], wo_ref[...], preferred_element_type=f32) + bo_ref[0]

    # TODO(synk): additive attention / key-padding mask support (mask=None path only);
    #             dropout is identity (eval mode).
    x1 = x_q + attn                                                            # f32 residual

    # ---- pre-norm feed-forward ----------------------------------------------------------
    # TODO(synk): for very large F on v7x, tile the FFN over F (inner accumulation loop)
    #             to bound w1/w2 VMEM residency.
    h2 = _layernorm(x1, g2_ref[0], be2_ref[0]).astype(bf16)
    f = jnp.dot(h2, w1_ref[...], preferred_element_type=f32) + bf1_ref[0]
    f = jnp.maximum(f, 0.0).astype(bf16)
    y = jnp.dot(f, w2_ref[...], preferred_element_type=f32) + bf2_ref[0]

    o_ref[0] = (x1 + y).astype(o_ref.dtype)


def transformer_encoder_layer(x, params, num_heads):
    B, S, D = x.shape
    F = params["w1"].shape[1]
    assert D % num_heads == 0
    dh = D // num_heads
    bf16 = jnp.bfloat16

    vmem_cap = _tpu_vmem_capacity_bytes()
    # Leave ~25% headroom for Mosaic-internal scratch: ~48 MiB on v7x, ~96 MiB on v5e/v6e.
    vmem_limit = int(min(vmem_cap * 3 // 4, 100 * 1024 * 1024))
    tile_s = _choose_q_tile(S, vmem_cap)
    n_q = S // tile_s

    # Weights in bf16 (MXU-native, halves weight VMEM/DMA). Biases / LN params stay f32.
    wq = params["wq"].astype(bf16); wk = params["wk"].astype(bf16)
    wv = params["wv"].astype(bf16); wo = params["wo"].astype(bf16)
    w1 = params["w1"].astype(bf16); w2 = params["w2"].astype(bf16)

    def const_spec(shape):
        # Whole array, constant block index -> DMA'd once for the whole grid.
        # Buffered(1): no double-buffering for blocks that never re-fetch (VMEM saver,
        # important on v7x's 64 MiB).
        return pl.BlockSpec(shape, lambda b, t: (0,) * len(shape),
                            pipeline_mode=pl.Buffered(1))

    in_specs = [
        # x: full sequence per batch, constant over the q-tile axis (one DMA per batch);
        # needed whole at q-tile 0 for the hoisted K/V projection.
        pl.BlockSpec((1, S, D), lambda b, t: (b, 0, 0)),
        const_spec((D, D)), const_spec((1, D)),        # wq, bq
        const_spec((D, D)), const_spec((1, D)),        # wk, bk
        const_spec((D, D)), const_spec((1, D)),        # wv, bv
        const_spec((D, D)), const_spec((1, D)),        # wo, bo
        const_spec((1, D)), const_spec((1, D)),        # attn_norm gamma / beta
        const_spec((D, F)), const_spec((1, F)),        # ff linear1
        const_spec((F, D)), const_spec((1, D)),        # ff linear2
        const_spec((1, D)), const_spec((1, D)),        # final_norm gamma / beta
    ]
    out_specs = pl.BlockSpec((1, tile_s, D), lambda b, t: (b, t, 0))

    kernel = functools.partial(encoder_layer_kernel,
                               num_heads=num_heads, tile_s=tile_s)

    # Advisory cost estimate (K/V + full-seq LayerNorm now really run once per batch).
    flops = B * (8 * S * D * D + 4 * S * S * D + 4 * S * D * F)
    transcendentals = B * num_heads * S * S
    bytes_accessed = (2 * B * S * D * 4                  # x in + out (f32)
                      + (4 * D * D + 2 * D * F) * 2      # bf16 weights, read once
                      + (7 * D + F) * 4)                 # biases + LayerNorm params
    cost = pl.CostEstimate(flops=int(flops), transcendentals=int(transcendentals),
                           bytes_accessed=int(bytes_accessed))

    # NOTE: for dh < 128 the head-major (H, S, dh) scratch pads lanes to 128; pairing
    # heads (dh=64 -> 128-lane slabs) would remove that padding. TODO(synk).
    scratch_shapes = [
        pltpu.VMEM((num_heads, S, dh), bf16),        # K (per-batch, head-major)
        pltpu.VMEM((num_heads, S, dh), bf16),        # V
        pltpu.VMEM((num_heads, tile_s, dh), bf16),   # Q staging (per-tile)
        pltpu.VMEM((tile_s, D), bf16),               # attention output (per-tile)
    ]

    return pl.pallas_call(
        kernel,
        out_shape=jax.ShapeDtypeStruct((B, S, D), x.dtype),
        grid_spec=pltpu.PrefetchScalarGridSpec(
            num_scalar_prefetch=0,
            grid=(B, n_q),
            in_specs=in_specs,
            out_specs=out_specs,
            scratch_shapes=scratch_shapes,
        ),
        compiler_params=pltpu.CompilerParams(
            # batch axis parallel (megacore / v7x 2-TC); q-tile axis arbitrary so the
            # pl.when(qi == 0)-initialized K/V scratch is carried sequentially.
            dimension_semantics=("parallel", "arbitrary"),
            vmem_limit_bytes=vmem_limit,
        ),
        cost_estimate=cost,
    )(
        x,
        wq, params["bq"], wk, params["bk"],
        wv, params["bv"], wo, params["bo"],
        params["g1"], params["be1"],
        w1, params["bf1"], w2, params["bf2"],
        params["g2"], params["be2"],
    )


def reference(x, p, num_heads):
    """Pure-JAX f32 reference (faithful to the PyTorch module in eval mode, mask=None)."""
    B, S, D = x.shape
    dh = D // num_heads
    h = _layernorm(x, p["g1"][0], p["be1"][0])
    q = h @ p["wq"] + p["bq"][0]
    k = h @ p["wk"] + p["bk"][0]
    v = h @ p["wv"] + p["bv"][0]
    qh = q.reshape(B, S, num_heads, dh).transpose(0, 2, 1, 3)
    kh = k.reshape(B, S, num_heads, dh).transpose(0, 2, 1, 3)
    vh = v.reshape(B, S, num_heads, dh).transpose(0, 2, 1, 3)
    s = jnp.einsum("bhqd,bhkd->bhqk", qh, kh) / math.sqrt(dh)
    pattn = jax.nn.softmax(s, axis=-1)
    o = jnp.einsum("bhqk,bhkd->bhqd", pattn, vh).transpose(0, 2, 1, 3).reshape(B, S, D)
    o = o @ p["wo"] + p["bo"][0]
    x1 = x + o
    h2 = _layernorm(x1, p["g2"][0], p["be2"][0])
    f = jnp.maximum(h2 @ p["w1"] + p["bf1"][0], 0.0) @ p["w2"] + p["bf2"][0]
    return x1 + f


if __name__ == "__main__":
    B, S, D, H, F = 2, 8, 32, 4, 64

    key = jax.random.PRNGKey(0)
    keys = jax.random.split(key, 16)

    def w(k, shape, scale):
        return (jax.random.normal(k, shape, jnp.float32) * scale).astype(jnp.float32)

    params = {
        "wq": w(keys[0], (D, D), 1.0 / math.sqrt(D)),
        "bq": w(keys[1], (1, D), 0.02),
        "wk": w(keys[2], (D, D), 1.0 / math.sqrt(D)),
        "bk": w(keys[3], (1, D), 0.02),
        "wv": w(keys[4], (D, D), 1.0 / math.sqrt(D)),
        "bv": w(keys[5], (1, D), 0.02),
        "wo": w(keys[6], (D, D), 1.0 / math.sqrt(D)),
        "bo": w(keys[7], (1, D), 0.02),
        "g1": jnp.ones((1, D), jnp.float32),
        "be1": jnp.zeros((1, D), jnp.float32),
        "w1": w(keys[8], (D, F), 1.0 / math.sqrt(D)),
        "bf1": w(keys[9], (1, F), 0.02),
        "w2": w(keys[10], (F, D), 1.0 / math.sqrt(F)),
        "bf2": w(keys[11], (1, D), 0.02),
        "g2": jnp.ones((1, D), jnp.float32),
        "be2": jnp.zeros((1, D), jnp.float32),
    }

    x = jax.random.normal(keys[12], (B, S, D), jnp.float32)

    out = transformer_encoder_layer(x, params, num_heads=H)
    out = jax.block_until_ready(out)

    ref = reference(x, params, num_heads=H)
    assert out.shape == (B, S, D)
    # Tolerance accounts for bf16 MXU operands (f32 accumulation & f32 residuals kept).
    assert jnp.allclose(out, ref, atol=5e-2, rtol=5e-2), "mismatch vs reference"

    print("KERNEL_OK")
</pallas_src>

<mosaic_0001>
module attributes {stable_mosaic.version = 11 : i64} {
  func.func @encoder_layer_kernel(%arg0: i32, %arg1: i32, %arg2: memref<1x8x32xf32, #tpu.memory_space<vmem>>, %arg3: memref<32x32xbf16, #tpu.memory_space<vmem>>, %arg4: memref<1x32xf32, #tpu.memory_space<vmem>>, %arg5: memref<32x32xbf16, #tpu.memory_space<vmem>>, %arg6: memref<1x32xf32, #tpu.memory_space<vmem>>, %arg7: memref<32x32xbf16, #tpu.memory_space<vmem>>, %arg8: memref<1x32xf32, #tpu.memory_space<vmem>>, %arg9: memref<32x32xbf16, #tpu.memory_space<vmem>>, %arg10: memref<1x32xf32, #tpu.memory_space<vmem>>, %arg11: memref<1x32xf32, #tpu.memory_space<vmem>>, %arg12: memref<1x32xf32, #tpu.memory_space<vmem>>, %arg13: memref<32x64xbf16, #tpu.memory_space<vmem>>, %arg14: memref<1x64xf32, #tpu.memory_space<vmem>>, %arg15: memref<64x32xbf16, #tpu.memory_space<vmem>>, %arg16: memref<1x32xf32, #tpu.memory_space<vmem>>, %arg17: memref<1x32xf32, #tpu.memory_space<vmem>>, %arg18: memref<1x32xf32, #tpu.memory_space<vmem>>, %arg19: memref<1x8x32xf32, #tpu.memory_space<vmem>>, %arg20: memref<4x8x8xbf16, #tpu.memory_space<vmem>>, %arg21: memref<4x8x8xbf16, #tpu.memory_space<vmem>>, %arg22: memref<4x8x8xbf16, #tpu.memory_space<vmem>>, %arg23: memref<8x32xbf16, #tpu.memory_space<vmem>>) attributes {dimension_semantics = [#tpu.dimension_semantics<parallel>, #tpu.dimension_semantics<arbitrary>], iteration_bounds = array<i64: 2, 1>, scalar_prefetch = 0 : i64, scratch_operands = 4 : i64, tpu.core_type = #tpu.core_type<tc>, window_params = [{transform_indices = @transform_0, window_bounds = array<i64: 1, 8, 32>}, {pipeline_mode = #tpu.pipeline_mode<synchronous>, transform_indices = @transform_1, window_bounds = array<i64: 32, 32>}, {pipeline_mode = #tpu.pipeline_mode<synchronous>, transform_indices = @transform_2, window_bounds = array<i64: 1, 32>}, {pipeline_mode = #tpu.pipeline_mode<synchronous>, transform_indices = @transform_3, window_bounds = array<i64: 32, 32>}, {pipeline_mode = #tpu.pipeline_mode<synchronous>, transform_indices = @transform_4, window_bounds = array<i64: 1, 32>}, {pipeline_mode = #tpu.pipeline_mode<synchronous>, transform_indices = @transform_5, window_bounds = array<i64: 32, 32>}, {pipeline_mode = #tpu.pipeline_mode<synchronous>, transform_indices = @transform_6, window_bounds = array<i64: 1, 32>}, {pipeline_mode = #tpu.pipeline_mode<synchronous>, transform_indices = @transform_7, window_bounds = array<i64: 32, 32>}, {pipeline_mode = #tpu.pipeline_mode<synchronous>, transform_indices = @transform_8, window_bounds = array<i64: 1, 32>}, {pipeline_mode = #tpu.pipeline_mode<synchronous>, transform_indices = @transform_9, window_bounds = array<i64: 1, 32>}, {pipeline_mode = #tpu.pipeline_mode<synchronous>, transform_indices = @transform_10, window_bounds = array<i64: 1, 32>}, {pipeline_mode = #tpu.pipeline_mode<synchronous>, transform_indices = @transform_11, window_bounds = array<i64: 32, 64>}, {pipeline_mode = #tpu.pipeline_mode<synchronous>, transform_indices = @transform_12, window_bounds = array<i64: 1, 64>}, {pipeline_mode = #tpu.pipeline_mode<synchronous>, transform_indices = @transform_13, window_bounds = array<i64: 64, 32>}, {pipeline_mode = #tpu.pipeline_mode<synchronous>, transform_indices = @transform_14, window_bounds = array<i64: 1, 32>}, {pipeline_mode = #tpu.pipeline_mode<synchronous>, transform_indices = @transform_15, window_bounds = array<i64: 1, 32>}, {pipeline_mode = #tpu.pipeline_mode<synchronous>, transform_indices = @transform_16, window_bounds = array<i64: 1, 32>}, {transform_indices = @transform_17, window_bounds = array<i64: 1, 8, 32>}]} {
    %c8_i32 = arith.constant 8 : i32
    %0 = arith.muli %arg1, %c8_i32 : i32
    %1 = tpu.assume_multiple %0, 8 : i32
    %c0 = arith.constant 0 : index
    %c0_0 = arith.constant 0 : index
    %2 = vector.load %arg11[%c0, %c0_0] : memref<1x32xf32, #tpu.memory_space<vmem>>, vector<1x32xf32>
    %3 = vector.shape_cast %2 : vector<1x32xf32> to vector<32xf32>
    %c0_1 = arith.constant 0 : index
    %c0_2 = arith.constant 0 : index
    %4 = vector.load %arg12[%c0_1, %c0_2] : memref<1x32xf32, #tpu.memory_space<vmem>>, vector<1x32xf32>
    %5 = vector.shape_cast %4 : vector<1x32xf32> to vector<32xf32>
    %c0_i32 = arith.constant 0 : i32
    %6 = arith.cmpi eq, %arg1, %c0_i32 : i32
    %7 = arith.extui %6 : i1 to i32
    %c0_i32_3 = arith.constant 0 : i32
    %8 = arith.cmpi ne, %7, %c0_i32_3 : i32
    scf.if %8 {
      %c0_73 = arith.constant 0 : index
      %c0_74 = arith.constant 0 : index
      %c0_75 = arith.constant 0 : index
      %154 = vector.load %arg2[%c0_73, %c0_74, %c0_75] : memref<1x8x32xf32, #tpu.memory_space<vmem>>, vector<1x8x32xf32>
      %155 = vector.shape_cast %154 : vector<1x8x32xf32> to vector<8x32xf32>
      %cst_76 = arith.constant dense<0.000000e+00> : vector<8xf32>
      %156 = vector.multi_reduction <add>, %155, %cst_76 [1] : vector<8x32xf32> to vector<8xf32>
      %157 = vector.shape_cast %156 : vector<8xf32> to vector<8x1xf32>
      %cst_77 = arith.constant 3.200000e+01 : f32
      %158 = vector.broadcast %cst_77 : f32 to vector<8x1xf32>
      %159 = arith.divf %157, %158 : vector<8x1xf32>
      %160 = vector.broadcast %159 : vector<8x1xf32> to vector<8x32xf32>
      %161 = arith.subf %155, %160 : vector<8x32xf32>
      %162 = arith.mulf %161, %161 : vector<8x32xf32>
      %cst_78 = arith.constant dense<0.000000e+00> : vector<8xf32>
      %163 = vector.multi_reduction <add>, %162, %cst_78 [1] : vector<8x32xf32> to vector<8xf32>
      %164 = vector.shape_cast %163 : vector<8xf32> to vector<8x1xf32>
      %cst_79 = arith.constant 3.200000e+01 : f32
      %165 = vector.broadcast %cst_79 : f32 to vector<8x1xf32>
      %166 = arith.divf %164, %165 : vector<8x1xf32>
      %cst_80 = arith.constant 9.99999974E-6 : f32
      %167 = vector.broadcast %cst_80 : f32 to vector<8x1xf32>
      %168 = arith.addf %166, %167 : vector<8x1xf32>
      %169 = math.rsqrt %168 : vector<8x1xf32>
      %170 = vector.broadcast %159 : vector<8x1xf32> to vector<8x32xf32>
      %171 = arith.subf %155, %170 : vector<8x32xf32>
      %172 = vector.broadcast %169 : vector<8x1xf32> to vector<8x32xf32>
      %173 = arith.mulf %171, %172 : vector<8x32xf32>
      %174 = vector.shape_cast %3 : vector<32xf32> to vector<1x32xf32>
      %175 = vector.broadcast %174 : vector<1x32xf32> to vector<8x32xf32>
      %176 = arith.mulf %173, %175 : vector<8x32xf32>
      %177 = vector.shape_cast %5 : vector<32xf32> to vector<1x32xf32>
      %178 = vector.broadcast %177 : vector<1x32xf32> to vector<8x32xf32>
      %179 = arith.addf %176, %178 : vector<8x32xf32>
      %180 = arith.truncf %179 : vector<8x32xf32> to vector<8x32xbf16>
      %c0_81 = arith.constant 0 : index
      %c0_82 = arith.constant 0 : index
      %181 = vector.load %arg5[%c0_81, %c0_82] : memref<32x32xbf16, #tpu.memory_space<vmem>>, vector<32x32xbf16>
      %cst_83 = arith.constant dense<0.000000e+00> : vector<8x32xf32>
      %182 = tpu.matmul %180, %181, %cst_83 {dimension_numbers = #tpu.dot_dimension_numbers<[1], [0], [0], [1], [0, 0, 1, 1], [], []>} : vector<8x32xbf16>, vector<32x32xbf16>, vector<8x32xf32> -> vector<8x32xf32>
      %c0_84 = arith.constant 0 : index
      %c0_85 = arith.constant 0 : index
      %183 = vector.load %arg6[%c0_84, %c0_85] : memref<1x32xf32, #tpu.memory_space<vmem>>, vector<1x32xf32>
      %184 = vector.shape_cast %183 : vector<1x32xf32> to vector<32xf32>
      %185 = vector.shape_cast %184 : vector<32xf32> to vector<1x32xf32>
      %186 = vector.broadcast %185 : vector<1x32xf32> to vector<8x32xf32>
      %187 = arith.addf %182, %186 : vector<8x32xf32>
      %c0_86 = arith.constant 0 : index
      %c0_87 = arith.constant 0 : index
      %188 = vector.load %arg7[%c0_86, %c0_87] : memref<32x32xbf16, #tpu.memory_space<vmem>>, vector<32x32xbf16>
      %cst_88 = arith.constant dense<0.000000e+00> : vector<8x32xf32>
      %189 = tpu.matmul %180, %188, %cst_88 {dimension_numbers = #tpu.dot_dimension_numbers<[1], [0], [0], [1], [0, 0, 1, 1], [], []>} : vector<8x32xbf16>, vector<32x32xbf16>, vector<8x32xf32> -> vector<8x32xf32>
      %c0_89 = arith.constant 0 : index
      %c0_90 = arith.constant 0 : index
      %190 = vector.load %arg8[%c0_89, %c0_90] : memref<1x32xf32, #tpu.memory_space<vmem>>, vector<1x32xf32>
      %191 = vector.shape_cast %190 : vector<1x32xf32> to vector<32xf32>
      %192 = vector.shape_cast %191 : vector<32xf32> to vector<1x32xf32>
      %193 = vector.broadcast %192 : vector<1x32xf32> to vector<8x32xf32>
      %194 = arith.addf %189, %193 : vector<8x32xf32>
      %195 = vector.extract_strided_slice %187 {offsets = [0, 0], sizes = [8, 8], strides = [1, 1]} : vector<8x32xf32> to vector<8x8xf32>
      %196 = arith.truncf %195 : vector<8x8xf32> to vector<8x8xbf16>
      %c0_91 = arith.constant 0 : index
      %c0_92 = arith.constant 0 : index
      %c0_93 = arith.constant 0 : index
      %197 = vector.load %arg20[%c0_91, %c0_92, %c0_93] : memref<4x8x8xbf16, #tpu.memory_space<vmem>>, vector<1x8x8xbf16>
      %198 = vector.shape_cast %197 : vector<1x8x8xbf16> to vector<8x8xbf16>
      %199 = vector.shape_cast %196 : vector<8x8xbf16> to vector<1x8x8xbf16>
      tpu.vector_store %arg20[%c0_91, %c0_92, %c0_93], %199 {strides = array<i32>} : memref<4x8x8xbf16, #tpu.memory_space<vmem>>, vector<1x8x8xbf16>,
      %200 = vector.extract_strided_slice %194 {offsets = [0, 0], sizes = [8, 8], strides = [1, 1]} : vector<8x32xf32> to vector<8x8xf32>
      %201 = arith.truncf %200 : vector<8x8xf32> to vector<8x8xbf16>
      %c0_94 = arith.constant 0 : index
      %c0_95 = arith.constant 0 : index
      %c0_96 = arith.constant 0 : index
      %202 = vector.load %arg21[%c0_94, %c0_95, %c0_96] : memref<4x8x8xbf16, #tpu.memory_space<vmem>>, vector<1x8x8xbf16>
      %203 = vector.shape_cast %202 : vector<1x8x8xbf16> to vector<8x8xbf16>
      %204 = vector.shape_cast %201 : vector<8x8xbf16> to vector<1x8x8xbf16>
      tpu.vector_store %arg21[%c0_94, %c0_95, %c0_96], %204 {strides = array<i32>} : memref<4x8x8xbf16, #tpu.memory_space<vmem>>, vector<1x8x8xbf16>,
      %205 = vector.extract_strided_slice %187 {offsets = [0, 8], sizes = [8, 8], strides = [1, 1]} : vector<8x32xf32> to vector<8x8xf32>
      %206 = arith.truncf %205 : vector<8x8xf32> to vector<8x8xbf16>
      %c1_97 = arith.constant 1 : index
      %c0_98 = arith.constant 0 : index
      %c0_99 = arith.constant 0 : index
      %207 = vector.load %arg20[%c1_97, %c0_98, %c0_99] : memref<4x8x8xbf16, #tpu.memory_space<vmem>>, vector<1x8x8xbf16>
      %208 = vector.shape_cast %207 : vector<1x8x8xbf16> to vector<8x8xbf16>
      %209 = vector.shape_cast %206 : vector<8x8xbf16> to vector<1x8x8xbf16>
      tpu.vector_store %arg20[%c1_97, %c0_98, %c0_99], %209 {strides = array<i32>} : memref<4x8x8xbf16, #tpu.memory_space<vmem>>, vector<1x8x8xbf16>,
      %210 = vector.extract_strided_slice %194 {offsets = [0, 8], sizes = [8, 8], strides = [1, 1]} : vector<8x32xf32> to vector<8x8xf32>
      %211 = arith.truncf %210 : vector<8x8xf32> to vector<8x8xbf16>
      %c1_100 = arith.constant 1 : index
      %c0_101 = arith.constant 0 : index
      %c0_102 = arith.constant 0 : index
      %212 = vector.load %arg21[%c1_100, %c0_101, %c0_102] : memref<4x8x8xbf16, #tpu.memory_space<vmem>>, vector<1x8x8xbf16>
      %213 = vector.shape_cast %212 : vector<1x8x8xbf16> to vector<8x8xbf16>
      %214 = vector.shape_cast %211 : vector<8x8xbf16> to vector<1x8x8xbf16>
      tpu.vector_store %arg21[%c1_100, %c0_101, %c0_102], %214 {strides = array<i32>} : memref<4x8x8xbf16, #tpu.memory_space<vmem>>, vector<1x8x8xbf16>,
      %215 = vector.extract_strided_slice %187 {offsets = [0, 16], sizes = [8, 8], strides = [1, 1]} : vector<8x32xf32> to vector<8x8xf32>
      %216 = arith.truncf %215 : vector<8x8xf32> to vector<8x8xbf16>
      %c2_103 = arith.constant 2 : index
      %c0_104 = arith.constant 0 : index
      %c0_105 = arith.constant 0 : index
      %217 = vector.load %arg20[%c2_103, %c0_104, %c0_105] : memref<4x8x8xbf16, #tpu.memory_space<vmem>>, vector<1x8x8xbf16>
      %218 = vector.shape_cast %217 : vector<1x8x8xbf16> to vector<8x8xbf16>
      %219 = vector.shape_cast %216 : vector<8x8xbf16> to vector<1x8x8xbf16>
      tpu.vector_store %arg20[%c2_103, %c0_104, %c0_105], %219 {strides = array<i32>} : memref<4x8x8xbf16, #tpu.memory_space<vmem>>, vector<1x8x8xbf16>,
      %220 = vector.extract_strided_slice %194 {offsets = [0, 16], sizes = [8, 8], strides = [1, 1]} : vector<8x32xf32> to vector<8x8xf32>
      %221 = arith.truncf %220 : vector<8x8xf32> to vector<8x8xbf16>
      %c2_106 = arith.constant 2 : index
      %c0_107 = arith.constant 0 : index
      %c0_108 = arith.constant 0 : index
      %222 = vector.load %arg21[%c2_106, %c0_107, %c0_108] : memref<4x8x8xbf16, #tpu.memory_space<vmem>>, vector<1x8x8xbf16>
      %223 = vector.shape_cast %222 : vector<1x8x8xbf16> to vector<8x8xbf16>
      %224 = vector.shape_cast %221 : vector<8x8xbf16> to vector<1x8x8xbf16>
      tpu.vector_store %arg21[%c2_106, %c0_107, %c0_108], %224 {strides = array<i32>} : memref<4x8x8xbf16, #tpu.memory_space<vmem>>, vector<1x8x8xbf16>,
      %225 = vector.extract_strided_slice %187 {offsets = [0, 24], sizes = [8, 8], strides = [1, 1]} : vector<8x32xf32> to vector<8x8xf32>
      %226 = arith.truncf %225 : vector<8x8xf32> to vector<8x8xbf16>
      %c3_109 = arith.constant 3 : index
      %c0_110 = arith.constant 0 : index
      %c0_111 = arith.constant 0 : index
      %227 = vector.load %arg20[%c3_109, %c0_110, %c0_111] : memref<4x8x8xbf16, #tpu.memory_space<vmem>>, vector<1x8x8xbf16>
      %228 = vector.shape_cast %227 : vector<1x8x8xbf16> to vector<8x8xbf16>
      %229 = vector.shape_cast %226 : vector<8x8xbf16> to vector<1x8x8xbf16>
      tpu.vector_store %arg20[%c3_109, %c0_110, %c0_111], %229 {strides = array<i32>} : memref<4x8x8xbf16, #tpu.memory_space<vmem>>, vector<1x8x8xbf16>,
      %230 = vector.extract_strided_slice %194 {offsets = [0, 24], sizes = [8, 8], strides = [1, 1]} : vector<8x32xf32> to vector<8x8xf32>
      %231 = arith.truncf %230 : vector<8x8xf32> to vector<8x8xbf16>
      %c3_112 = arith.constant 3 : index
      %c0_113 = arith.constant 0 : index
      %c0_114 = arith.constant 0 : index
      %232 = vector.load %arg21[%c3_112, %c0_113, %c0_114] : memref<4x8x8xbf16, #tpu.memory_space<vmem>>, vector<1x8x8xbf16>
      %233 = vector.shape_cast %232 : vector<1x8x8xbf16> to vector<8x8xbf16>
      %234 = vector.shape_cast %231 : vector<8x8xbf16> to vector<1x8x8xbf16>
      tpu.vector_store %arg21[%c3_112, %c0_113, %c0_114], %234 {strides = array<i32>} : memref<4x8x8xbf16, #tpu.memory_space<vmem>>, vector<1x8x8xbf16>,
    } else {
    }
    %c0_4 = arith.constant 0 : index
    %9 = arith.index_cast %1 : i32 to index
    %c0_5 = arith.constant 0 : index
    %10 = vector.load %arg2[%c0_4, %9, %c0_5] : memref<1x8x32xf32, #tpu.memory_space<vmem>>, vector<1x8x32xf32>
    %11 = vector.shape_cast %10 : vector<1x8x32xf32> to vector<8x32xf32>
    %cst = arith.constant dense<0.000000e+00> : vector<8xf32>
    %12 = vector.multi_reduction <add>, %11, %cst [1] : vector<8x32xf32> to vector<8xf32>
    %13 = vector.shape_cast %12 : vector<8xf32> to vector<8x1xf32>
    %cst_6 = arith.constant 3.200000e+01 : f32
    %14 = vector.broadcast %cst_6 : f32 to vector<8x1xf32>
    %15 = arith.divf %13, %14 : vector<8x1xf32>
    %16 = vector.broadcast %15 : vector<8x1xf32> to vector<8x32xf32>
    %17 = arith.subf %11, %16 : vector<8x32xf32>
    %18 = arith.mulf %17, %17 : vector<8x32xf32>
    %cst_7 = arith.constant dense<0.000000e+00> : vector<8xf32>
    %19 = vector.multi_reduction <add>, %18, %cst_7 [1] : vector<8x32xf32> to vector<8xf32>
    %20 = vector.shape_cast %19 : vector<8xf32> to vector<8x1xf32>
    %cst_8 = arith.constant 3.200000e+01 : f32
    %21 = vector.broadcast %cst_8 : f32 to vector<8x1xf32>
    %22 = arith.divf %20, %21 : vector<8x1xf32>
    %cst_9 = arith.constant 9.99999974E-6 : f32
    %23 = vector.broadcast %cst_9 : f32 to vector<8x1xf32>
    %24 = arith.addf %22, %23 : vector<8x1xf32>
    %25 = math.rsqrt %24 : vector<8x1xf32>
    %26 = vector.broadcast %15 : vector<8x1xf32> to vector<8x32xf32>
    %27 = arith.subf %11, %26 : vector<8x32xf32>
    %28 = vector.broadcast %25 : vector<8x1xf32> to vector<8x32xf32>
    %29 = arith.mulf %27, %28 : vector<8x32xf32>
    %30 = vector.shape_cast %3 : vector<32xf32> to vector<1x32xf32>
    %31 = vector.broadcast %30 : vector<1x32xf32> to vector<8x32xf32>
    %32 = arith.mulf %29, %31 : vector<8x32xf32>
    %33 = vector.shape_cast %5 : vector<32xf32> to vector<1x32xf32>
    %34 = vector.broadcast %33 : vector<1x32xf32> to vector<8x32xf32>
    %35 = arith.addf %32, %34 : vector<8x32xf32>
    %36 = arith.truncf %35 : vector<8x32xf32> to vector<8x32xbf16>
    %c0_10 = arith.constant 0 : index
    %c0_11 = arith.constant 0 : index
    %37 = vector.load %arg3[%c0_10, %c0_11] : memref<32x32xbf16, #tpu.memory_space<vmem>>, vector<32x32xbf16>
    %cst_12 = arith.constant dense<0.000000e+00> : vector<8x32xf32>
    %38 = tpu.matmul %36, %37, %cst_12 {dimension_numbers = #tpu.dot_dimension_numbers<[1], [0], [0], [1], [0, 0, 1, 1], [], []>} : vector<8x32xbf16>, vector<32x32xbf16>, vector<8x32xf32> -> vector<8x32xf32>
    %c0_13 = arith.constant 0 : index
    %c0_14 = arith.constant 0 : index
    %39 = vector.load %arg4[%c0_13, %c0_14] : memref<1x32xf32, #tpu.memory_space<vmem>>, vector<1x32xf32>
    %40 = vector.shape_cast %39 : vector<1x32xf32> to vector<32xf32>
    %41 = vector.shape_cast %40 : vector<32xf32> to vector<1x32xf32>
    %42 = vector.broadcast %41 : vector<1x32xf32> to vector<8x32xf32>
    %43 = arith.addf %38, %42 : vector<8x32xf32>
    %cst_15 = arith.constant 0.353553385 : f32
    %44 = vector.broadcast %cst_15 : f32 to vector<8x32xf32>
    %45 = arith.mulf %43, %44 : vector<8x32xf32>
    %46 = vector.extract_strided_slice %45 {offsets = [0, 0], sizes = [8, 8], strides = [1, 1]} : vector<8x32xf32> to vector<8x8xf32>
    %47 = arith.truncf %46 : vector<8x8xf32> to vector<8x8xbf16>
    %c0_16 = arith.constant 0 : index
    %c0_17 = arith.constant 0 : index
    %c0_18 = arith.constant 0 : index
    %48 = vector.load %arg22[%c0_16, %c0_17, %c0_18] : memref<4x8x8xbf16, #tpu.memory_space<vmem>>, vector<1x8x8xbf16>
    %49 = vector.shape_cast %48 : vector<1x8x8xbf16> to vector<8x8xbf16>
    %50 = vector.shape_cast %47 : vector<8x8xbf16> to vector<1x8x8xbf16>
    tpu.vector_store %arg22[%c0_16, %c0_17, %c0_18], %50 {strides = array<i32>} : memref<4x8x8xbf16, #tpu.memory_space<vmem>>, vector<1x8x8xbf16>,
    %51 = vector.extract_strided_slice %45 {offsets = [0, 8], sizes = [8, 8], strides = [1, 1]} : vector<8x32xf32> to vector<8x8xf32>
    %52 = arith.truncf %51 : vector<8x8xf32> to vector<8x8xbf16>
    %c1 = arith.constant 1 : index
    %c0_19 = arith.constant 0 : index
    %c0_20 = arith.constant 0 : index
    %53 = vector.load %arg22[%c1, %c0_19, %c0_20] : memref<4x8x8xbf16, #tpu.memory_space<vmem>>, vector<1x8x8xbf16>
    %54 = vector.shape_cast %53 : vector<1x8x8xbf16> to vector<8x8xbf16>
    %55 = vector.shape_cast %52 : vector<8x8xbf16> to vector<1x8x8xbf16>
    tpu.vector_store %arg22[%c1, %c0_19, %c0_20], %55 {strides = array<i32>} : memref<4x8x8xbf16, #tpu.memory_space<vmem>>, vector<1x8x8xbf16>,
    %56 = vector.extract_strided_slice %45 {offsets = [0, 16], sizes = [8, 8], strides = [1, 1]} : vector<8x32xf32> to vector<8x8xf32>
    %57 = arith.truncf %56 : vector<8x8xf32> to vector<8x8xbf16>
    %c2 = arith.constant 2 : index
    %c0_21 = arith.constant 0 : index
    %c0_22 = arith.constant 0 : index
    %58 = vector.load %arg22[%c2, %c0_21, %c0_22] : memref<4x8x8xbf16, #tpu.memory_space<vmem>>, vector<1x8x8xbf16>
    %59 = vector.shape_cast %58 : vector<1x8x8xbf16> to vector<8x8xbf16>
    %60 = vector.shape_cast %57 : vector<8x8xbf16> to vector<1x8x8xbf16>
    tpu.vector_store %arg22[%c2, %c0_21, %c0_22], %60 {strides = array<i32>} : memref<4x8x8xbf16, #tpu.memory_space<vmem>>, vector<1x8x8xbf16>,
    %61 = vector.extract_strided_slice %45 {offsets = [0, 24], sizes = [8, 8], strides = [1, 1]} : vector<8x32xf32> to vector<8x8xf32>
    %62 = arith.truncf %61 : vector<8x8xf32> to vector<8x8xbf16>
    %c3 = arith.constant 3 : index
    %c0_23 = arith.constant 0 : index
    %c0_24 = arith.constant 0 : index
    %63 = vector.load %arg22[%c3, %c0_23, %c0_24] : memref<4x8x8xbf16, #tpu.memory_space<vmem>>, vector<1x8x8xbf16>
    %64 = vector.shape_cast %63 : vector<1x8x8xbf16> to vector<8x8xbf16>
    %65 = vector.shape_cast %62 : vector<8x8xbf16> to vector<1x8x8xbf16>
    tpu.vector_store %arg22[%c3, %c0_23, %c0_24], %65 {strides = array<i32>} : memref<4x8x8xbf16, #tpu.memory_space<vmem>>, vector<1x8x8xbf16>,
    %c0_25 = arith.constant 0 : index
    %c0_26 = arith.constant 0 : index
    %c0_27 = arith.constant 0 : index
    %66 = vector.load %arg22[%c0_25, %c0_26, %c0_27] : memref<4x8x8xbf16, #tpu.memory_space<vmem>>, vector<4x8x8xbf16>
    %c0_28 = arith.constant 0 : index
    %c0_29 = arith.constant 0 : index
    %c0_30 = arith.constant 0 : index
    %67 = vector.load %arg20[%c0_28, %c0_29, %c0_30] : memref<4x8x8xbf16, #tpu.memory_space<vmem>>, vector<4x8x8xbf16>
    "tpu.trace_start"() <{level = 10 : i32, message = "hqd,hkd->hqk"}> : () -> ()
    %cst_31 = arith.constant dense<0.000000e+00> : vector<4x8x8xf32>
    %68 = tpu.matmul %66, %67, %cst_31 {dimension_numbers = #tpu.dot_dimension_numbers<[2], [2], [1], [1], [0, 0, 0, 1, 1, 1], [0], [0]>} : vector<4x8x8xbf16>, vector<4x8x8xbf16>, vector<4x8x8xf32> -> vector<4x8x8xf32>
    "tpu.trace_stop"() : () -> ()
    %cst_32 = arith.constant dense<0xFF800000> : vector<4x8xf32>
    %69 = vector.multi_reduction <maximumf>, %68, %cst_32 [2] : vector<4x8x8xf32> to vector<4x8xf32>
    %70 = vector.shape_cast %69 : vector<4x8xf32> to vector<4x8x1xf32>
    %71 = vector.broadcast %70 : vector<4x8x1xf32> to vector<4x8x8xf32>
    %72 = arith.subf %68, %71 : vector<4x8x8xf32>
    %73 = math.exp %72 : vector<4x8x8xf32>
    %cst_33 = arith.constant dense<0.000000e+00> : vector<4x8xf32>
    %74 = vector.multi_reduction <add>, %73, %cst_33 [2] : vector<4x8x8xf32> to vector<4x8xf32>
    %75 = vector.shape_cast %74 : vector<4x8xf32> to vector<4x8x1xf32>
    %76 = arith.truncf %73 : vector<4x8x8xf32> to vector<4x8x8xbf16>
    %c0_34 = arith.constant 0 : index
    %c0_35 = arith.constant 0 : index
    %c0_36 = arith.constant 0 : index
    %77 = vector.load %arg21[%c0_34, %c0_35, %c0_36] : memref<4x8x8xbf16, #tpu.memory_space<vmem>>, vector<4x8x8xbf16>
    "tpu.trace_start"() <{level = 10 : i32, message = "hqk,hkd->hqd"}> : () -> ()
    %cst_37 = arith.constant dense<0.000000e+00> : vector<4x8x8xf32>
    %78 = tpu.matmul %76, %77, %cst_37 {dimension_numbers = #tpu.dot_dimension_numbers<[2], [1], [1], [2], [0, 0, 0, 1, 1, 2], [0], [0]>} : vector<4x8x8xbf16>, vector<4x8x8xbf16>, vector<4x8x8xf32> -> vector<4x8x8xf32>
    "tpu.trace_stop"() : () -> ()
    %79 = tpu.reciprocal %75 {approx = true} : vector<4x8x1xf32> -> vector<4x8x1xf32>
    %80 = vector.broadcast %79 : vector<4x8x1xf32> to vector<4x8x8xf32>
    %81 = arith.mulf %78, %80 : vector<4x8x8xf32>
    %82 = arith.truncf %81 : vector<4x8x8xf32> to vector<4x8x8xbf16>
    %83 = vector.extract_strided_slice %82 {offsets = [0, 0, 0], sizes = [1, 8, 8], strides = [1, 1, 1]} : vector<4x8x8xbf16> to vector<1x8x8xbf16>
    %84 = vector.shape_cast %83 : vector<1x8x8xbf16> to vector<8x8xbf16>
    %c0_38 = arith.constant 0 : index
    %c0_39 = arith.constant 0 : index
    %85 = vector.load %arg23[%c0_38, %c0_39] : memref<8x32xbf16, #tpu.memory_space<vmem>>, vector<8x8xbf16>
    tpu.vector_store %arg23[%c0_38, %c0_39], %84 {strides = array<i32>} : memref<8x32xbf16, #tpu.memory_space<vmem>>, vector<8x8xbf16>,
    %86 = vector.extract_strided_slice %82 {offsets = [1, 0, 0], sizes = [1, 8, 8], strides = [1, 1, 1]} : vector<4x8x8xbf16> to vector<1x8x8xbf16>
    %87 = vector.shape_cast %86 : vector<1x8x8xbf16> to vector<8x8xbf16>
    %c0_40 = arith.constant 0 : index
    %c8 = arith.constant 8 : index
    %88 = vector.load %arg23[%c0_40, %c8] : memref<8x32xbf16, #tpu.memory_space<vmem>>, vector<8x8xbf16>
    tpu.vector_store %arg23[%c0_40, %c8], %87 {strides = array<i32>} : memref<8x32xbf16, #tpu.memory_space<vmem>>, vector<8x8xbf16>,
    %89 = vector.extract_strided_slice %82 {offsets = [2, 0, 0], sizes = [1, 8, 8], strides = [1, 1, 1]} : vector<4x8x8xbf16> to vector<1x8x8xbf16>
    %90 = vector.shape_cast %89 : vector<1x8x8xbf16> to vector<8x8xbf16>
    %c0_41 = arith.constant 0 : index
    %c16 = arith.constant 16 : index
    %91 = vector.load %arg23[%c0_41, %c16] : memref<8x32xbf16, #tpu.memory_space<vmem>>, vector<8x8xbf16>
    tpu.vector_store %arg23[%c0_41, %c16], %90 {strides = array<i32>} : memref<8x32xbf16, #tpu.memory_space<vmem>>, vector<8x8xbf16>,
    %92 = vector.extract_strided_slice %82 {offsets = [3, 0, 0], sizes = [1, 8, 8], strides = [1, 1, 1]} : vector<4x8x8xbf16> to vector<1x8x8xbf16>
    %93 = vector.shape_cast %92 : vector<1x8x8xbf16> to vector<8x8xbf16>
    %c0_42 = arith.constant 0 : index
    %c24 = arith.constant 24 : index
    %94 = vector.load %arg23[%c0_42, %c24] : memref<8x32xbf16, #tpu.memory_space<vmem>>, vector<8x8xbf16>
    tpu.vector_store %arg23[%c0_42, %c24], %93 {strides = array<i32>} : memref<8x32xbf16, #tpu.memory_space<vmem>>, vector<8x8xbf16>,
    %c0_43 = arith.constant 0 : index
    %c0_44 = arith.constant 0 : index
    %95 = vector.load %arg23[%c0_43, %c0_44] : memref<8x32xbf16, #tpu.memory_space<vmem>>, vector<8x32xbf16>
    %c0_45 = arith.constant 0 : index
    %c0_46 = arith.constant 0 : index
    %96 = vector.load %arg9[%c0_45, %c0_46] : memref<32x32xbf16, #tpu.memory_space<vmem>>, vector<32x32xbf16>
    %cst_47 = arith.constant dense<0.000000e+00> : vector<8x32xf32>
    %97 = tpu.matmul %95, %96, %cst_47 {dimension_numbers = #tpu.dot_dimension_numbers<[1], [0], [0], [1], [0, 0, 1, 1], [], []>} : vector<8x32xbf16>, vector<32x32xbf16>, vector<8x32xf32> -> vector<8x32xf32>
    %c0_48 = arith.constant 0 : index
    %c0_49 = arith.constant 0 : index
    %98 = vector.load %arg10[%c0_48, %c0_49] : memref<1x32xf32, #tpu.memory_space<vmem>>, vector<1x32xf32>
    %99 = vector.shape_cast %98 : vector<1x32xf32> to vector<32xf32>
    %100 = vector.shape_cast %99 : vector<32xf32> to vector<1x32xf32>
    %101 = vector.broadcast %100 : vector<1x32xf32> to vector<8x32xf32>
    %102 = arith.addf %97, %101 : vector<8x32xf32>
    %103 = arith.addf %11, %102 : vector<8x32xf32>
    %c0_50 = arith.constant 0 : index
    %c0_51 = arith.constant 0 : index
    %104 = vector.load %arg17[%c0_50, %c0_51] : memref<1x32xf32, #tpu.memory_space<vmem>>, vector<1x32xf32>
    %105 = vector.shape_cast %104 : vector<1x32xf32> to vector<32xf32>
    %c0_52 = arith.constant 0 : index
    %c0_53 = arith.constant 0 : index
    %106 = vector.load %arg18[%c0_52, %c0_53] : memref<1x32xf32, #tpu.memory_space<vmem>>, vector<1x32xf32>
    %107 = vector.shape_cast %106 : vector<1x32xf32> to vector<32xf32>
    %cst_54 = arith.constant dense<0.000000e+00> : vector<8xf32>
    %108 = vector.multi_reduction <add>, %103, %cst_54 [1] : vector<8x32xf32> to vector<8xf32>
    %109 = vector.shape_cast %108 : vector<8xf32> to vector<8x1xf32>
    %cst_55 = arith.constant 3.200000e+01 : f32
    %110 = vector.broadcast %cst_55 : f32 to vector<8x1xf32>
    %111 = arith.divf %109, %110 : vector<8x1xf32>
    %112 = vector.broadcast %111 : vector<8x1xf32> to vector<8x32xf32>
    %113 = arith.subf %103, %112 : vector<8x32xf32>
    %114 = arith.mulf %113, %113 : vector<8x32xf32>
    %cst_56 = arith.constant dense<0.000000e+00> : vector<8xf32>
    %115 = vector.multi_reduction <add>, %114, %cst_56 [1] : vector<8x32xf32> to vector<8xf32>
    %116 = vector.shape_cast %115 : vector<8xf32> to vector<8x1xf32>
    %cst_57 = arith.constant 3.200000e+01 : f32
    %117 = vector.broadcast %cst_57 : f32 to vector<8x1xf32>
    %118 = arith.divf %116, %117 : vector<8x1xf32>
    %cst_58 = arith.constant 9.99999974E-6 : f32
    %119 = vector.broadcast %cst_58 : f32 to vector<8x1xf32>
    %120 = arith.addf %118, %119 : vector<8x1xf32>
    %121 = math.rsqrt %120 : vector<8x1xf32>
    %122 = vector.broadcast %111 : vector<8x1xf32> to vector<8x32xf32>
    %123 = arith.subf %103, %122 : vector<8x32xf32>
    %124 = vector.broadcast %121 : vector<8x1xf32> to vector<8x32xf32>
    %125 = arith.mulf %123, %124 : vector<8x32xf32>
    %126 = vector.shape_cast %105 : vector<32xf32> to vector<1x32xf32>
    %127 = vector.broadcast %126 : vector<1x32xf32> to vector<8x32xf32>
    %128 = arith.mulf %125, %127 : vector<8x32xf32>
    %129 = vector.shape_cast %107 : vector<32xf32> to vector<1x32xf32>
    %130 = vector.broadcast %129 : vector<1x32xf32> to vector<8x32xf32>
    %131 = arith.addf %128, %130 : vector<8x32xf32>
    %132 = arith.truncf %131 : vector<8x32xf32> to vector<8x32xbf16>
    %c0_59 = arith.constant 0 : index
    %c0_60 = arith.constant 0 : index
    %133 = vector.load %arg13[%c0_59, %c0_60] : memref<32x64xbf16, #tpu.memory_space<vmem>>, vector<32x64xbf16>
    %cst_61 = arith.constant dense<0.000000e+00> : vector<8x64xf32>
    %134 = tpu.matmul %132, %133, %cst_61 {dimension_numbers = #tpu.dot_dimension_numbers<[1], [0], [0], [1], [0, 0, 1, 1], [], []>} : vector<8x32xbf16>, vector<32x64xbf16>, vector<8x64xf32> -> vector<8x64xf32>
    %c0_62 = arith.constant 0 : index
    %c0_63 = arith.constant 0 : index
    %135 = vector.load %arg14[%c0_62, %c0_63] : memref<1x64xf32, #tpu.memory_space<vmem>>, vector<1x64xf32>
    %136 = vector.shape_cast %135 : vector<1x64xf32> to vector<64xf32>
    %137 = vector.shape_cast %136 : vector<64xf32> to vector<1x64xf32>
    %138 = vector.broadcast %137 : vector<1x64xf32> to vector<8x64xf32>
    %139 = arith.addf %134, %138 : vector<8x64xf32>
    %cst_64 = arith.constant 0.000000e+00 : f32
    %140 = vector.broadcast %cst_64 : f32 to vector<8x64xf32>
    %141 = arith.maximumf %139, %140 : vector<8x64xf32>
    %142 = arith.truncf %141 : vector<8x64xf32> to vector<8x64xbf16>
    %c0_65 = arith.constant 0 : index
    %c0_66 = arith.constant 0 : index
    %143 = vector.load %arg15[%c0_65, %c0_66] : memref<64x32xbf16, #tpu.memory_space<vmem>>, vector<64x32xbf16>
    %cst_67 = arith.constant dense<0.000000e+00> : vector<8x32xf32>
    %144 = tpu.matmul %142, %143, %cst_67 {dimension_numbers = #tpu.dot_dimension_numbers<[1], [0], [0], [1], [0, 0, 1, 1], [], []>} : vector<8x64xbf16>, vector<64x32xbf16>, vector<8x32xf32> -> vector<8x32xf32>
    %c0_68 = arith.constant 0 : index
    %c0_69 = arith.constant 0 : index
    %145 = vector.load %arg16[%c0_68, %c0_69] : memref<1x32xf32, #tpu.memory_space<vmem>>, vector<1x32xf32>
    %146 = vector.shape_cast %145 : vector<1x32xf32> to vector<32xf32>
    %147 = vector.shape_cast %146 : vector<32xf32> to vector<1x32xf32>
    %148 = vector.broadcast %147 : vector<1x32xf32> to vector<8x32xf32>
    %149 = arith.addf %144, %148 : vector<8x32xf32>
    %150 = arith.addf %103, %149 : vector<8x32xf32>
    %c0_70 = arith.constant 0 : index
    %c0_71 = arith.constant 0 : index
    %c0_72 = arith.constant 0 : index
    %151 = vector.load %arg19[%c0_70, %c0_71, %c0_72] : memref<1x8x32xf32, #tpu.memory_space<vmem>>, vector<1x8x32xf32>
    %152 = vector.shape_cast %151 : vector<1x8x32xf32> to vector<8x32xf32>
    %153 = vector.shape_cast %150 : vector<8x32xf32> to vector<1x8x32xf32>
    tpu.vector_store %arg19[%c0_70, %c0_71, %c0_72], %153 {strides = array<i32>} : memref<1x8x32xf32, #tpu.memory_space<vmem>>, vector<1x8x32xf32>,
    return
  }
  func.func @transform_0(%arg0: i32, %arg1: i32) -> (i32, i32, i32) {
    %c0_i32 = arith.constant 0 : i32
    %c0_i32_0 = arith.constant 0 : i32
    %c0_i32_1 = arith.constant 0 : i32
    return %arg0, %c0_i32, %c0_i32_0 : i32, i32, i32
  }
  func.func @transform_1(%arg0: i32, %arg1: i32) -> (i32, i32) {
    %c0_i32 = arith.constant 0 : i32
    %c0_i32_0 = arith.constant 0 : i32
    %c0_i32_1 = arith.constant 0 : i32
    return %c0_i32, %c0_i32_0 : i32, i32
  }
  func.func @transform_2(%arg0: i32, %arg1: i32) -> (i32, i32) {
    %c0_i32 = arith.constant 0 : i32
    %c0_i32_0 = arith.constant 0 : i32
    %c0_i32_1 = arith.constant 0 : i32
    return %c0_i32, %c0_i32_0 : i32, i32
  }
  func.func @transform_3(%arg0: i32, %arg1: i32) -> (i32, i32) {
    %c0_i32 = arith.constant 0 : i32
    %c0_i32_0 = arith.constant 0 : i32
    %c0_i32_1 = arith.constant 0 : i32
    return %c0_i32, %c0_i32_0 : i32, i32
  }
  func.func @transform_4(%arg0: i32, %arg1: i32) -> (i32, i32) {
    %c0_i32 = arith.constant 0 : i32
    %c0_i32_0 = arith.constant 0 : i32
    %c0_i32_1 = arith.constant 0 : i32
    return %c0_i32, %c0_i32_0 : i32, i32
  }
  func.func @transform_5(%arg0: i32, %arg1: i32) -> (i32, i32) {
    %c0_i32 = arith.constant 0 : i32
    %c0_i32_0 = arith.constant 0 : i32
    %c0_i32_1 = arith.constant 0 : i32
    return %c0_i32, %c0_i32_0 : i32, i32
  }
  func.func @transform_6(%arg0: i32, %arg1: i32) -> (i32, i32) {
    %c0_i32 = arith.constant 0 : i32
    %c0_i32_0 = arith.constant 0 : i32
    %c0_i32_1 = arith.constant 0 : i32
    return %c0_i32, %c0_i32_0 : i32, i32
  }
  func.func @transform_7(%arg0: i32, %arg1: i32) -> (i32, i32) {
    %c0_i32 = arith.constant 0 : i32
    %c0_i32_0 = arith.constant 0 : i32
    %c0_i32_1 = arith.constant 0 : i32
    return %c0_i32, %c0_i32_0 : i32, i32
  }
  func.func @transform_8(%arg0: i32, %arg1: i32) -> (i32, i32) {
    %c0_i32 = arith.constant 0 : i32
    %c0_i32_0 = arith.constant 0 : i32
    %c0_i32_1 = arith.constant 0 : i32
    return %c0_i32, %c0_i32_0 : i32, i32
  }
  func.func @transform_9(%arg0: i32, %arg1: i32) -> (i32, i32) {
    %c0_i32 = arith.constant 0 : i32
    %c0_i32_0 = arith.constant 0 : i32
    %c0_i32_1 = arith.constant 0 : i32
    return %c0_i32, %c0_i32_0 : i32, i32
  }
  func.func @transform_10(%arg0: i32, %arg1: i32) -> (i32, i32) {
    %c0_i32 = arith.constant 0 : i32
    %c0_i32_0 = arith.constant 0 : i32
    %c0_i32_1 = arith.constant 0 : i32
    return %c0_i32, %c0_i32_0 : i32, i32
  }
  func.func @transform_11(%arg0: i32, %arg1: i32) -> (i32, i32) {
    %c0_i32 = arith.constant 0 : i32
    %c0_i32_0 = arith.constant 0 : i32
    %c0_i32_1 = arith.constant 0 : i32
    return %c0_i32, %c0_i32_0 : i32, i32
  }
  func.func @transform_12(%arg0: i32, %arg1: i32) -> (i32, i32) {
    %c0_i32 = arith.constant 0 : i32
    %c0_i32_0 = arith.constant 0 : i32
    %c0_i32_1 = arith.constant 0 : i32
    return %c0_i32, %c0_i32_0 : i32, i32
  }
  func.func @transform_13(%arg0: i32, %arg1: i32) -> (i32, i32) {
    %c0_i32 = arith.constant 0 : i32
    %c0_i32_0 = arith.constant 0 : i32
    %c0_i32_1 = arith.constant 0 : i32
    return %c0_i32, %c0_i32_0 : i32, i32
  }
  func.func @transform_14(%arg0: i32, %arg1: i32) -> (i32, i32) {
    %c0_i32 = arith.constant 0 : i32
    %c0_i32_0 = arith.constant 0 : i32
    %c0_i32_1 = arith.constant 0 : i32
    return %c0_i32, %c0_i32_0 : i32, i32
  }
  func.func @transform_15(%arg0: i32, %arg1: i32) -> (i32, i32) {
    %c0_i32 = arith.constant 0 : i32
    %c0_i32_0 = arith.constant 0 : i32
    %c0_i32_1 = arith.constant 0 : i32
    return %c0_i32, %c0_i32_0 : i32, i32
  }
  func.func @transform_16(%arg0: i32, %arg1: i32) -> (i32, i32) {
    %c0_i32 = arith.constant 0 : i32
    %c0_i32_0 = arith.constant 0 : i32
    %c0_i32_1 = arith.constant 0 : i32
    return %c0_i32, %c0_i32_0 : i32, i32
  }
  func.func @transform_17(%arg0: i32, %arg1: i32) -> (i32, i32, i32) {
    %c0_i32 = arith.constant 0 : i32
    %c0_i32_0 = arith.constant 0 : i32
    return %arg0, %arg1, %c0_i32 : i32, i32, i32
  }
}

</mosaic_0001>

<bundles_post_ra>
// kernel: tpu_custom_call.1
= control target key start
LH: loop header
LB: loop body
LE: loop exit
PB: predicated region body
PF: predicated region fallthrough
CT: control target
= control target key end

     0   :  { %s2920_s0 = inlined_call_operand.vmem [shape: f32[2,8,32], index: 0, kind: input, shape index: {}]   ;;  %s2921_s1 = inlined_call_operand.vmem [shape: bf16[32,32], index: 1, kind: input, shape index: {}]   ;;  %s2922_s2 = inlined_call_operand.vmem [shape: f32[1,32], index: 2, kind: input, shape index: {}]   ;;  %s2923_s3 = inlined_call_operand.vmem [shape: bf16[32,32], index: 3, kind: input, shape index: {}]   ;;  %s2924_s4 = inlined_call_operand.vmem [shape: f32[1,32], index: 4, kind: input, shape index: {}]   ;;  %s2925_s5 = inlined_call_operand.hbm [shape: bf16[32,32], index: 5, kind: input, shape index: {}]   ;;  %s2926_s6 = inlined_call_operand.hbm [shape: f32[1,32], index: 6, kind: input, shape index: {}]   ;;  %s2927_s7 = inlined_call_operand.hbm [shape: bf16[32,32], index: 7, kind: input, shape index: {}]   ;;  %s2928_s8 = inlined_call_operand.hbm [shape: f32[1,32], index: 8, kind: input, shape index: {}]   ;;  %s2929_s9 = inlined_call_operand.hbm [shape: f32[1,32], index: 9, kind: input, shape index: {}]   ;;  %s2930_s10 = inlined_call_operand.vmem [shape: f32[1,32], index: 10, kind: input, shape index: {}]   ;;  %s2931_s11 = inlined_call_operand.vmem [shape: bf16[32,64], index: 11, kind: input, shape index: {}]   ;;  %s2932_s12 = inlined_call_operand.vmem [shape: f32[1,64], index: 12, kind: input, shape index: {}]   ;;  %s2933_s13 = inlined_call_operand.vmem [shape: bf16[64,32], index: 13, kind: input, shape index: {}]   ;;  %s2934_s14 = inlined_call_operand.vmem [shape: f32[1,32], index: 14, kind: input, shape index: {}]   ;;  %s2935_s15 = inlined_call_operand.vmem [shape: f32[1,32], index: 15, kind: input, shape index: {}]   ;;  %s2936_s16 = inlined_call_operand.vmem [shape: f32[1,32], index: 16, kind: input, shape index: {}]   ;;  %s2937_s17 = inlined_call_operand.hbm [shape: f32[2,8,32], index: 17, kind: output, shape index: {}]  }
   0x1   :  { %2953 = sst [smem:[#allocation28_spill]] %s2920_s0 }
   0x2   :  { %2954 = sst [smem:[#allocation29_spill]] %s2921_s1 }
   0x3   :  { %2955 = sst [smem:[#allocation30_spill]] %s2926_s6 }
   0x4   :  { %2956 = sst [smem:[#allocation31_spill]] %s2928_s8 }
   0x5   :  { %2957 = sst [smem:[#allocation32_spill]] %s2932_s12 }
   0x6   :  { %2958 = sst [smem:[#allocation33_spill]] %s2934_s14 }
   0x7   :  { %2959 = sst [smem:[#allocation34_spill]] %s2937_s17 }
   0x8   :  { %22 = vsyncpa [#allocation7], 0 }
   0x9   :  { %23 = vsyncpa [#allocation10], 0 }
   0xa   :  { %24 = vsyncpa [#allocation13], 0 }
   0xb   :  { %25 = vsyncpa [#allocation8], 0 }
   0xc   :  { %27 = vsyncpa [#allocation8 + $0x1], 0  ;;  %s2496_s24 = smov 0   ;;  %s2498_s25 = smov 0  }
   0xd   :  { %s2500_s26 = smov 0   ;;  %s2502_s27 = smov 0  }
   0xe   :  { %s2504_s28 = smov 0   ;;  %s2506_s29 = smov 0  }
   0xf LB: > { %2960 = sst [smem:[#allocation20_spill]] %s2368_s24  ;;  %s1799_s0 = sadd.s32 4294967295, %s2388_s29   ;;  %s2388_s29 = sphi %s2506_s29, %s33_s29   ;;  %s2384_s28 = sphi %s2504_s28, %s2992_s28   ;;  %s2380_s27 = sphi %s2502_s27, %s2991_s27   ;;  %s2376_s26 = sphi %s2500_s26, %s2990_s26   ;;  %s2372_s25 = sphi %s2498_s25, %s2994_s25   ;;  %s2368_s24 = sphi %s2496_s24, %s2993_s24  }
  0x10   : > { %2961 = sst [smem:[#allocation21_spill]] %s2376_s26  ;;  %s1800_s30 = sadd.s32 4294967294, %s2388_s29  }
  0x11   : > { %2962 = sst [smem:[#allocation22_spill]] %s2384_s28  ;;  %s45_s18 = sadd.s32 1, %s2384_s28 }
  0x12   : > { %2963 = sst [smem:[#allocation23_spill]] %s2388_s29  ;;  %s416_s19 = sadd.s32 1, %s2376_s26 }
  0x13   : > { %p47_p0 = scmp.ge.s32.totalorder %s45_s18, 2  ;;  %p426_p1 = scmp.ne.s32.totalorder %s2376_s26, %s2372_s25 }
  0x14   : > { %p427_p2 = scmp.eq.s32.totalorder %s1799_s0, 1  ;;  %p432_p3 = scmp.ne.s32.totalorder %s2372_s25, %s2368_s24 }
  0x15   : > { %s2996_s18 = smov (%p47_p0, %s45_s18), 0  ;;  %p433_p5 = scmp.eq.s32.totalorder %s1800_s30, 1 }
  0x16   : > { %2964 = sst [smem:[#allocation24_spill]] %s2996_s18  ;;  %p2536_p4 = por %p427_p2, %p426_p1 }
  0x17   : > { %s411_s20 = ssub.s32 %s2384_s28, %s2996_s18  ;;  %p1801_p6 = scmp.ge.s32.totalorder %s2388_s29, 1 }
  0x18   : > { %s2965_s1 = scalar_select %p2536_p4, 1, 0 }
  0x19   : > { %p414_p7 = scmp.eq.s32.totalorder %s411_s20, 0  ;;  %p2543_p8 = por %p433_p5, %p432_p3 }
  0x1a   : > { %2966 = sst [smem:[#allocation25_spill]] %s2965_s1  ;;  %p440_p9 = scmp.lt.s32.totalorder %s2388_s29, 3 }
  0x1b   : > { %s2967_s21 = scalar_select %p2543_p8, 1, 0 }
  0x1c   : > { %s2549_s22 = scalar_select %p414_p7, %s2376_s26, %s416_s19  }
  0x1d   : > { %2968 = sst [smem:[#allocation26_spill]] %s2967_s21  ;;  %p2551_p10 = pnand %p1801_p6, %p440_p9 }
  0x1e   : > { %2969 = sst [smem:[#allocation27_spill]] %s2549_s22  ;;  %p2555_p11 = scmp.eq.s32.totalorder %s1799_s0, 0 }
  0x1f   : > { %s2970_s23 = scalar_select %p2551_p10, 1, 0 }
  0x20   : > { %s2971_s24 = scalar_select %p2555_p11, 1, 0 }
  0x21   : > { %p2028_p12 = pneg %p2551_p10  ;;  %s2390_s30 = smov [#allocation9]  }
  0x22   : > { %s478_s20 = sshll.u32 %s2390_s30, 4  ;;  %s2391_s18 = smov [#allocation12]   ;;  %s479_s20 = int_to_ptr.vmem [resolvable:$true] %s478_s20 }
  0x23   : > { %s502_s28 = sshll.u32 %s2391_s18, 4  ;;  %p2563_p13 = pnand %p2555_p11, %p2028_p12  ;;  %s2567_s28 = int_to_ptr.vmem [resolvable:$true] %s502_s28 }
  0x24   : > { %s2973_s6 = sld [smem:[#allocation30_spill]] }
  0x25   : > { %p2577_p1 = pneg %p2563_p13 }
  0x2a   : > { %s2158_s26 = scalar_lea.hbm %s2973_s6, 16 }
  0x2b   : > { %p2159_p0 = scmp.ne.s32.totalorder %s2973_s6, %s2158_s26  ;;  %p2165_p5 = scmp.lt.u32.totalorder %s2158_s26, %s2973_s6 }
  0x2d   : > { %p2161_p2 = pnand %p2577_p1, %p2159_p0 }
  0x2f   : > { %p2162_p3 = pneg %p2161_p2 }
  0x31   : > { %p2167_p6 = pnand %p2165_p5, %p2162_p3 }
  0x33   : > { %2170 = shalt.err (!%p2167_p6)
}
  0x34   : > { %s2171_s22 = scalar_lea.vmem %s479_s20, 16  ;;  %s2178_s29 = scalar_lea.vmem %s479_s20, 32 }
  0x35   : > { %p2172_p7 = scmp.ne.s32.totalorder %s479_s20, %s2171_s22  ;;  %p2179_p8 = scmp.lt.s32.totalorder %s479_s20, %s479_s20 }
  0x36   : > { %p2180_p4 = scmp.lt.s32.totalorder %s2178_s29, %s2171_s22 }
  0x37   : > { %p2174_p9 = pnand %p2172_p7, %p2577_p1 }
  0x38   : > { %p2181_p11 = por %p2180_p4, %p2179_p8 }
  0x39   : > { %p2175_p12 = pneg %p2174_p9 }
  0x3b   : > { %p2182_p10 = pnand %p2181_p11, %p2175_p12 }
  0x3d   : > { %2185 = shalt.err (!%p2182_p10)
}
  0x3e   : > { %2034 = dma.hbm_to_vmem [thread:$0]  (!%p2563_p13), %s2973_s6, 16, %s479_s20, [#allocation10]  }
  0x3f   : > { %s2975_s8 = sld [smem:[#allocation31_spill]] }
  0x45   : > { %s2186_s18 = scalar_lea.hbm %s2975_s8, 16 }
  0x46   : > { %p2187_p0 = scmp.ne.s32.totalorder %s2975_s8, %s2186_s18  ;;  %p2193_p8 = scmp.lt.u32.totalorder %s2186_s18, %s2975_s8 }
  0x48   : > { %p2189_p2 = pnand %p2187_p0, %p2577_p1 }
  0x4a   : > { %p2190_p4 = pneg %p2189_p2 }
  0x4c   : > { %p2195_p10 = pnand %p2193_p8, %p2190_p4 }
  0x4e   : > { %2198 = shalt.err (!%p2195_p10)
}
  0x4f   : > { %s2199_s20 = scalar_lea.vmem %s2567_s28, 16  ;;  %s2206_s14 = scalar_lea.vmem %s2567_s28, 32 }
  0x50   : > { %p2200_p11 = scmp.ne.s32.totalorder %s2567_s28, %s2199_s20  ;;  %p2207_p6 = scmp.lt.s32.totalorder %s2567_s28, %s2567_s28 }
  0x51   : > { %p2208_p7 = scmp.lt.s32.totalorder %s2206_s14, %s2199_s20 }
  0x52   : > { %p2202_p3 = pnand %p2200_p11, %p2577_p1 }
  0x53   : > { %p2209_p9 = por %p2208_p7, %p2207_p6 }
  0x54   : > { %p2203_p5 = pneg %p2202_p3 }
  0x56   : > { %p2210_p12 = pnand %p2209_p9, %p2203_p5 }
  0x58   : > { %2213 = shalt.err (!%p2210_p12)
}
  0x59   : > { %2040 = dma.hbm_to_vmem [thread:$0]  (!%p2563_p13), %s2975_s8, 16, %s2567_s28, [#allocation13]  }
  0x5a   : > { %s2392_s0 = smov [#allocation6]   ;;  %s2214_s22 = scalar_lea.hbm %s2925_s5, 256 }
  0x5b   : > { %s464_s17 = sshll.u32 %s2392_s0, 4  ;;  %p2215_p0 = scmp.ne.s32.totalorder %s2925_s5, %s2214_s22  ;;  %s465_s17 = int_to_ptr.vmem [resolvable:$true] %s464_s17 }
  0x5c   : > { %p2221_p8 = scmp.lt.u32.totalorder %s2214_s22, %s2925_s5 }
  0x5d   : > { %p2217_p2 = pnand %p2215_p0, %p2577_p1 }
  0x5f   : > { %p2218_p4 = pneg %p2217_p2 }
  0x61   : > { %p2223_p10 = pnand %p2221_p8, %p2218_p4 }
  0x63   : > { %2226 = shalt.err (!%p2223_p10)
}
  0x64   : > { %s2227_s28 = scalar_lea.vmem %s465_s17, 256  ;;  %p2235_p6 = scmp.lt.s32.totalorder %s465_s17, %s465_s17 }
  0x65   : > { %p2228_p11 = scmp.ne.s32.totalorder %s465_s17, %s2227_s28  ;;  %p2236_p7 = scmp.lt.s32.totalorder %s2227_s28, %s2227_s28 }
  0x67   : > { %p2230_p3 = pnand %p2228_p11, %p2577_p1  ;;  %p2237_p9 = por %p2236_p7, %p2235_p6 }
  0x69   : > { %p2231_p5 = pneg %p2230_p3 }
  0x6b   : > { %p2238_p12 = pnand %p2237_p9, %p2231_p5 }
  0x6d   : > { %2241 = shalt.err (!%p2238_p12)
}
  0x6e   : > { %s2393_s1 = smov 64   ;;  %s2394_s21 = smov 4  }
  0x6f   : > { %2031 = dma.hbm_to_vmem [thread:$0]  (!%p2563_p13), %s2925_s5, 256, %s465_s17, [#allocation7], %s2393_s1, %s2393_s1, %s2394_s21  }
  0x70   : > { %s2395_s26 = smov [#allocation11]   ;;  %s2396_s22 = smov [#allocation14]  }
  0x71   : > { %s488_s18 = sshll.u32 %s2395_s26, 4  ;;  %s513_s29 = sshll.u32 %s2396_s22, 4  ;;  %s489_s18 = int_to_ptr.vmem [resolvable:$true] %s488_s18  ;;  %s2635_s29 = int_to_ptr.vmem [resolvable:$true] %s513_s29 }
  0x72   : > { %s2242_s28 = scalar_lea.hbm %s2927_s7, 256 }
  0x73   : > { %p2243_p0 = scmp.ne.s32.totalorder %s2927_s7, %s2242_s28  ;;  %p2249_p8 = scmp.lt.u32.totalorder %s2242_s28, %s2927_s7 }
  0x75   : > { %p2245_p2 = pnand %p2243_p0, %p2577_p1 }
  0x77   : > { %p2246_p4 = pneg %p2245_p2 }
  0x79   : > { %p2251_p10 = pnand %p2249_p8, %p2246_p4 }
  0x7b   : > { %2254 = shalt.err (!%p2251_p10)
}
  0x7c   : > { %s2255_s0 = scalar_lea.vmem %s489_s18, 256  ;;  %p2263_p6 = scmp.lt.s32.totalorder %s489_s18, %s489_s18 }
  0x7d   : > { %p2256_p11 = scmp.ne.s32.totalorder %s489_s18, %s2255_s0  ;;  %p2264_p7 = scmp.lt.s32.totalorder %s2255_s0, %s2255_s0 }
  0x7f   : > { %p2258_p3 = pnand %p2256_p11, %p2577_p1  ;;  %p2265_p9 = por %p2264_p7, %p2263_p6 }
  0x81   : > { %p2259_p5 = pneg %p2258_p3 }
  0x83   : > { %p2266_p12 = pnand %p2265_p9, %p2259_p5 }
  0x85   : > { %2269 = shalt.err (!%p2266_p12)
}
  0x86   : > { %2037 = dma.hbm_to_vmem [thread:$0]  (!%p2563_p13), %s2927_s7, 256, %s489_s18, [#allocation10], %s2393_s1, %s2393_s1, %s2394_s21  }
  0x87   : > { %s2270_s20 = scalar_lea.hbm %s2929_s9, 16 }
  0x88   : > { %p2271_p0 = scmp.ne.s32.totalorder %s2929_s9, %s2270_s20  ;;  %p2277_p8 = scmp.lt.u32.totalorder %s2270_s20, %s2929_s9 }
  0x8a   : > { %p2273_p2 = pnand %p2271_p0, %p2577_p1 }
  0x8c   : > { %p2274_p4 = pneg %p2273_p2 }
  0x8e   : > { %p2279_p10 = pnand %p2277_p8, %p2274_p4 }
  0x90   : > { %2282 = shalt.err (!%p2279_p10)
}
  0x91   : > { %s2283_s1 = scalar_lea.vmem %s2635_s29, 16  ;;  %s2290_s21 = scalar_lea.vmem %s2635_s29, 32 }
  0x92   : > { %p2284_p11 = scmp.ne.s32.totalorder %s2635_s29, %s2283_s1  ;;  %p2291_p6 = scmp.lt.s32.totalorder %s2635_s29, %s2635_s29 }
  0x93   : > { %p2292_p7 = scmp.lt.s32.totalorder %s2290_s21, %s2283_s1 }
  0x94   : > { %p2286_p3 = pnand %p2284_p11, %p2577_p1 }
  0x95   : > { %p2293_p9 = por %p2292_p7, %p2291_p6 }
  0x96   : > { %p2287_p5 = pneg %p2286_p3 }
  0x98   : > { %p2294_p12 = pnand %p2293_p9, %p2287_p5 }
  0x9a   : > { %2297 = shalt.err (!%p2294_p12)
}
  0x9b   : > { %2043 = dma.hbm_to_vmem [thread:$0]  (!%p2563_p13), %s2929_s9, 16, %s2635_s29, [#allocation13]  }
  0x9c   : > { %p2976_p0 = scmp.ne.s32.totalorder %s2970_s23, 0 }
  0x9d   : > { %p2977_p1 = scmp.ne.s32.totalorder (!%p2976_p0), %s2971_s24, 0 }
  0x9e   : > { %554 = sbr.rel (%p2976_p0) target bundleno = 2547 (0x9f3), region = 88 }
  0xa5   : > { %2351 = dma.done.wait (%p2977_p1), [#allocation7], 256  }
  0xa6   : > { %2353 = vsyncadd (%p2977_p1), [#allocation7], 4294967040 }
  0xa7   : > { %2355 = dma.done.wait (%p2977_p1), [#allocation10], 272  }
  0xa8   : > { %2357 = vsyncadd (%p2977_p1), [#allocation10], 4294967024 }
  0xa9   : > { %2359 = dma.done.wait (%p2977_p1), [#allocation13], 32  }
  0xaa   : > { %2361 = vsyncadd (%p2977_p1), [#allocation13], 4294967264  ;;  %p621_p13 = scmp.lt.s32.totalorder %s2380_s27, 1  ;;  %s2978_s8 = sld [smem:[#allocation28_spill]]  ;;  %vm634_vm0 = vcmask 261120   ;;  %v2122_v12 = vld [vmem:[%s2923_s3] sm:$0xff]  }
  0xab   : > { %v2123_v13 = vld [vmem:[#allocation6] sm:$0xff]   ;;  %v2397_v14 = vmov 0.0   ;;  %v2124_v15 = vld [vmem:[%s2923_s3 + $0x8] sm:$0xff]   ;;  %v2125_v16 = vld [vmem:[#allocation6 + $0x8] sm:$0xff]   ;;  %vm2398_vm1 = vmmov 0   ;;  %s2979_s1 = sld [smem:[#allocation29_spill]] }
  0xac   : > { %s622_s23 = scalar_select %p621_p13, %s2380_s27, 1  ;;  %1906 = vmatprep.subr.bf16.mxu0 %v2397_v14  ;;  %1914 = vmatprep.subr.bf16.mxu1 %v2397_v14  ;;  %v1868_v24 = vld [vmem:[#allocation14] ss:$0 sm:$0xff]  ;;  %v1869_v26 = vld [vmem:[%s2930_s10] ss:$0 sm:$0xff]  ;;  %vm794_vm2 = vcmask 60416  }
  0xad   : > { %1907 = vmatpush3.bf16.msra.mxu0 %v2122_v12  ;;  %1915 = vmatpush3.bf16.msra.mxu1 %v2123_v13  ;;  %v1816_v37 = vld [vmem:[%s2924_s4] ss:$0 sm:$0xff]  ;;  %v1820_v38 = vld [vmem:[#allocation9] ss:$0 sm:$0xff]  ;;  %s2400_s30 = smov 120   ;;  %vm962_vm3 = vcmask 64512  }
  0xae   : > { %s1815_s19 = sshll.u32 %s622_s23, 3  ;;  %1908 = vmatprep.subr.bf16.mxu0 %v2397_v14  ;;  %1916 = vmatprep.subr.bf16.mxu1 %v2397_v14  ;;  %v1826_v51 = vld [vmem:[%s2922_s2] ss:$0 sm:$0xff]  ;;  %vm1194_vm4 = vcmask 1043456   ;;  %s2402_s24 = smov 16   ;;  %vm1395_vm5 = vcmask 126016  }
  0xaf   : > { %1910 = vmatprep.mubr.msk.bf16.mxu0 %vm2398_vm1, %v2397_v14  ;;  %1918 = vmatprep.mubr.msk.bf16.mxu1 %vm2398_vm1, %v2397_v14  ;;  %s2403_s26 = smov 8   ;;  %s2404_s22 = smov 24   ;;  %vm1403_vm6 = vcmask 191616   ;;  %vm1411_vm7 = vcmask 257216   ;;  %vm1618_vm8 = vcmask 523264  }
  0xb0   : > { %s624_s12 = scalar_lea.vmem %s2978_s8, %s1815_s19  ;;  %s2399_s19 = smov 112  }
  0xb1   : > { %v2698_v0 = vld [vmem:[%s624_s12] sm:$0xff]  ;;  %1909 = vmatpush3.bf16.msra.mxu0 %v2124_v15  ;;  %1917 = vmatpush3.bf16.msra.mxu1 %v2125_v16  ;;  %v2127_v34 = vld [vmem:[%s2979_s1 + $0x8] sm:$0xff]   ;;  %s2401_s12 = smov 104   ;;  %s2980_s14 = sld [smem:[#allocation32_spill]] }
  0xb2   : > { %v635_v1 = vsel %vm634_vm0, %v2698_v0, 0.0  ;;  %1922 = vmatprep.subr.bf16.mxu0 %v2397_v14  ;;  %1930 = vmatprep.subr.bf16.mxu1 %v2397_v14  ;;  %v2126_v31 = vld [vmem:[%s2979_s1] sm:$0xff]   ;;  %s618_s28 = sand.u32 1, %s2372_s25   ;;  %s2981_s18 = sld [smem:[#allocation33_spill]] }
  0xb3   : > { %636 = vadd.xlane.f32.xlu0 %v635_v1  ;;  %s1814_s6 = sshll.u32 %s618_s28, 3  ;;  %s2982_s0 = sld [smem:[#allocation25_spill]] }
  0xb4   : > { %s1859_s23 = sshll.u32 %s2380_s27, 7  ;;  %s1665_s27 = scalar_lea.sflag [#allocation8], %s618_s28 }
  0xb7   : > { %838 = vadd.xlane.f32.xlu0 %v635_v1 }
  0xb9   : > { %p2984_p4 = scmp.ne.s32.totalorder %s2982_s0, 0 }
 0x140   : > { %v637_v2 = vpop.xlane.xlu0 %636 }
 0x141   : > { %v639_v3 = vmul.f32 0.03125, %v637_v2 }
 0x143   : > { %v640_v4 = vsub.f32 %v2698_v0, %v639_v3 }
 0x144   : > { %v839_v5 = vpop.xlane.xlu0 %838 }
 0x145   : > { %v841_v6 = vmul.f32 0.03125, %v839_v5  ;;  %v641_v7 = vmul.f32 %v640_v4, %v640_v4 }
 0x147   : > { %v842_v8 = vsub.f32 %v2698_v0, %v841_v6  ;;  %v642_v9 = vsel %vm634_vm0, %v641_v7, 0.0 }
 0x148   : > { %643 = vadd.xlane.f32.xlu1 %v642_v9 }
 0x149   : > { %v843_v10 = vmul.f32 %v842_v8, %v842_v8 }
 0x14b   : > { %v844_v11 = vsel %vm634_vm0, %v843_v10, 0.0 }
 0x14c   : > { %845 = vadd.xlane.f32.xlu1 %v844_v11 }
 0x1d5   : > { %v644_v17 = vpop.xlane.xlu1 %643 }
 0x1d6   : > { %v645_v18 = vmul.f32 0.03125, %v644_v17 }
 0x1d8   : > { %v646_v19 = vadd.f32 1e-05, %v645_v18 }
 0x1d9   : > { %v846_v20 = vpop.xlane.xlu1 %845 }
 0x1da   : > { %2136 = vrsqrt.f32 %v646_v19  ;;  %v847_v21 = vmul.f32 0.03125, %v846_v20 }
 0x1dc   : > { %v848_v22 = vadd.f32 1e-05, %v847_v21 }
 0x1de   : > { %2138 = vrsqrt.f32 %v848_v22 }
 0x1e4   : > { %v2137_v23 = vpop.eup %2136 }
 0x1e5   : > { %v648_v25 = vmul.f32 %v2137_v23, %v640_v4 }
 0x1e7   : > { %v655_v27 = vmul.f32 %v1868_v24, %v648_v25 }
 0x1e8   : > { %v2139_v28 = vpop.eup %2138 }
 0x1e9   : > { %v850_v29 = vmul.f32 %v2139_v28, %v842_v8  ;;  %v662_v30 = vadd.f32 %v1869_v26, %v655_v27 }
 0x1eb   : > { %v663_v32 = vpack.c.bf16 %v662_v30, %v662_v30  ;;  %v857_v33 = vmul.f32 %v1868_v24, %v850_v29 }
 0x1ed   : > { %1911 = vmatmul.mubr.msk.bf16.vlgmr.msra.gmra.mrb[0].mxu0 %vm634_vm0, %v663_v32  ;;  %1919 = vmatmul.mubr.msk.bf16.vlgmr.msra.gmra.mrb[0].mxu1 %vm634_vm0, %v663_v32  ;;  %v864_v35 = vadd.f32 %v1869_v26, %v857_v33 }
 0x1ee   : > { %1923 = vmatpush3.bf16.msra.mxu0 %v2126_v31  ;;  %1926 = vmatprep.mubr.msk.bf16.mxu0 %vm2398_vm1, %v2397_v14 }
 0x1ef   : > { %1924 = vmatprep.subr.bf16.mxu0 %v2397_v14  ;;  %1932 = vmatprep.mubr.msk.bf16.mxu1 %vm2398_vm1, %v2397_v14  ;;  %v865_v36 = vpack.c.bf16 %v864_v35, %v864_v35 }
 0x1f2   : > { %1925 = vmatpush3.bf16.msra.mxu0 %v2127_v34 }
 0x1f3   : > { %1936 = vmatprep.subr.bf16.mxu0 %v2397_v14 }
 0x1f5   : > { %1927 = vmatmul.mubr.msk.bf16.vlgmr.msra.gmra.mrb[4].mxu0 %vm634_vm0, %v865_v36 }
 0x1f6   : > { %1938 = vmatprep.mubr.msk.bf16.mxu0 %vm2398_vm1, %v2397_v14 }
 0x2c0   : > { %v724_v39 = vpop.f32.mrb[0].mxu0  ;;  %v787_v40 = vpop.f32.mrb[0].mxu1 }
 0x2c1   : > { %v725_v41 = vadd.f32 %v1816_v37, %v724_v39  ;;  %v788_v42 = vadd.f32 %v1820_v38, %v787_v40  ;;  %v1912_v43 = vpop.f32.mrb[1].mxu0  ;;  %v1920_v44 = vpop.f32.mrb[1].mxu1 }
 0x2c2   : > { %v727_v45 = vpop.f32.mrb[2].mxu0  ;;  %v790_v46 = vpop.f32.mrb[2].mxu1 }
 0x2c3   : > { %v793_v47 = vpack.c.bf16 %v725_v41, %v725_v41  ;;  %v2745_v48 = vpack.c.bf16 %v788_v42, %v788_v42  ;;  %v1913_v49 = vpop.f32.mrb[3].mxu0  ;;  %v1921_v50 = vpop.f32.mrb[3].mxu1 }
 0x2c5   : > { %795 = vst.msk [vmem:[#allocation2] sm:$0xf] %vm794_vm2, %v793_v47  ;;  %797 = vst.msk [vmem:[#allocation3] sm:$0xf] %vm794_vm2, %v2745_v48  ;;  %814 = vrot.lane.b32.xlu1 %v793_v47, %s2399_s19  ;;  %801 = vrot.lane.b32.xlu0 %v793_v47, %s2400_s30 }
 0x2c8   : > { %v926_v52 = vpop.f32.mrb[4].mxu0 }
 0x2c9   : > { %v927_v53 = vadd.f32 %v1826_v51, %v926_v52  ;;  %824 = vrot.lane.b32.xlu1 %v793_v47, %s2401_s12  ;;  %v1928_v54 = vpop.f32.mrb[5].mxu0 }
 0x2ca   : > { %v929_v55 = vpop.f32.mrb[6].mxu0 }
 0x2cb   : > { %v932_v56 = vmul.f32 0.35355338, %v927_v53  ;;  %v1929_v57 = vpop.f32.mrb[7].mxu0 }
 0x2cc   : > { %v958_v58 = vld [vmem:[#allocation2] sm:$0xf]  ;;  %v1187_v10 = vld [vmem:[#allocation3] sm:$0xf] }
 0x2cd   : > { %v933_v59 = vpack.c.bf16 %v932_v56, %v932_v56  ;;  %v967_v60 = vsel %vm962_vm3, %v958_v58, 0  ;;  %v1196_v15 = vsel %vm1194_vm4, %v1187_v10, 0 }
 0x2ce   : > { %1931 = vmatpush3.bf16.xpose.msra.mxu1 %v967_v60 }
 0x2cf   : > { %935 = vst.msk [vmem:[#allocation4] sm:$0xf] %vm794_vm2, %v933_v59  ;;  %944 = vrot.lane.b32.xlu0 %v933_v59, %s2399_s19  ;;  %939 = vrot.lane.b32.xlu1 %v933_v59, %s2400_s30 }
 0x2d0   : > { %1942 = vmatprep.subr.bf16.mxu1 %v2397_v14 }
 0x2d3   : > { %949 = vrot.lane.b32.xlu1 %v933_v59, %s2401_s12 }
 0x2d6   : > { %v954_v61 = vld [vmem:[#allocation4] sm:$0xf] }
 0x2d7   : > { %1933 = vmatmul.mubr.msk.bf16.vlgmr.msra.gmra.mrb[4].mxu1 %vm962_vm3, %v954_v61 }
 0x2d8   : > { %1944 = vmatprep.mubr.msk.bf16.mxu1 %vm2398_vm1, %v2397_v14 }
 0x337   : > { %v815_v62 = vpop.permute.xlu1 %814  ;;  %v802_v63 = vpop.permute.xlu0 %801 }
 0x338   : > { %818 = vst.msk [vmem:[#allocation2 + $0x8] sm:$0xf] %vm794_vm2, %v815_v62  ;;  %805 = vst.msk [vmem:[#allocation2 + $0x4] sm:$0xf] %vm794_vm2, %v802_v63 }
 0x33b   : > { %v825_v1 = vpop.permute.xlu1 %824 }
 0x33c   : > { %828 = vst.msk [vmem:[#allocation2 + $0xc] sm:$0xf] %vm794_vm2, %v825_v1 }
 0x33f   : > { %v959_v2 = vld [vmem:[#allocation2 + $0x4] sm:$0xf]  ;;  %v960_v3 = vld [vmem:[#allocation2 + $0x8] sm:$0xf] }
 0x340   : > { %v1013_v4 = vsel %vm962_vm3, %v959_v2, 0  ;;  %v1059_v5 = vsel %vm962_vm3, %v960_v3, 0 }
 0x341   : > { %1937 = vmatpush3.bf16.xpose.msra.mxu0 %v1013_v4  ;;  %v945_v6 = vpop.permute.xlu0 %944  ;;  %v940_v7 = vpop.permute.xlu1 %939  ;;  %1943 = vmatpush3.bf16.xpose.msra.mxu1 %v1059_v5 }
 0x342   : > { %948 = vst.msk [vmem:[#allocation4 + $0x8] sm:$0xf] %vm794_vm2, %v945_v6  ;;  %943 = vst.msk [vmem:[#allocation4 + $0x4] sm:$0xf] %vm794_vm2, %v940_v7  ;;  %1948 = vmatprep.subr.bf16.mxu0 %v2397_v14  ;;  %1954 = vmatprep.subr.bf16.mxu1 %v2397_v14 }
 0x343   : > { %v961_v9 = vld [vmem:[#allocation2 + $0xc] sm:$0xf] }
 0x344   : > { %v1105_v13 = vsel %vm962_vm3, %v961_v9, 0 }
 0x345   : > { %v950_v8 = vpop.permute.xlu1 %949 }
 0x346   : > { %953 = vst.msk [vmem:[#allocation4 + $0xc] sm:$0xf] %vm794_vm2, %v950_v8 }
 0x349   : > { %v955_v11 = vld [vmem:[#allocation4 + $0x4] sm:$0xf]  ;;  %v956_v12 = vld [vmem:[#allocation4 + $0x8] sm:$0xf] }
 0x34a   : > { %1939 = vmatmul.mubr.msk.bf16.vlgmr.msra.gmra.mrb[8].mxu0 %vm962_vm3, %v955_v11  ;;  %1945 = vmatmul.mubr.msk.bf16.vlgmr.msra.gmra.mrb[8].mxu1 %vm962_vm3, %v956_v12 }
 0x34b   : > { %1949 = vmatpush3.bf16.xpose.msra.mxu0 %v1105_v13  ;;  %1955 = vmatpush3.bf16.msra.mxu1 %v1196_v15 }
 0x34c   : > { %1950 = vmatprep.mubr.msk.bf16.mxu0 %vm2398_vm1, %v2397_v14  ;;  %1956 = vmatprep.mubr.msk.bf16.mxu1 %vm2398_vm1, %v2397_v14 }
 0x34d   : > { %1966 = vmatprep.subr.bf16.mxu1 %v2397_v14  ;;  %1960 = vmatprep.subr.bf16.mxu0 %v2397_v14  ;;  %v957_v16 = vld [vmem:[#allocation4 + $0xc] sm:$0xf] }
 0x352   : > { %1951 = vmatmul.mubr.msk.bf16.vlgmr.msra.gmra.mrb[12].mxu0 %vm962_vm3, %v957_v16 }
 0x353   : > { %1962 = vmatprep.mubr.msk.bf16.mxu0 %vm2398_vm1, %v2397_v14 }
 0x3aa   : > { %v1003_v17 = vpop.f32.mrb[4].mxu1 }
 0x3ab   : > { %v1934_v18 = vpop.f32.mrb[5].mxu1  ;;  %v1147_v19 = vsel %vm962_vm3, %v1003_v17, -inf }
 0x3ac   : > { %1148 = vmax.xlane.f32.xlu0 %v1147_v19  ;;  %v1006_v20 = vpop.f32.mrb[6].mxu1 }
 0x3ad   : > { %v1935_v21 = vpop.f32.mrb[7].mxu1 }
 0x41d   : > { %v1049_v22 = vpop.f32.mrb[8].mxu0  ;;  %v1095_v23 = vpop.f32.mrb[8].mxu1 }
 0x41e   : > { %v1940_v24 = vpop.f32.mrb[9].mxu0  ;;  %v1946_v25 = vpop.f32.mrb[9].mxu1  ;;  %v1153_v26 = vsel %vm962_vm3, %v1095_v23, -inf  ;;  %v1150_v27 = vsel %vm962_vm3, %v1049_v22, -inf }
 0x41f   : > { %1154 = vmax.xlane.f32.xlu0 %v1153_v26  ;;  %v1098_v28 = vpop.f32.mrb[10].mxu1  ;;  %1151 = vmax.xlane.f32.xlu1 %v1150_v27  ;;  %v1052_v29 = vpop.f32.mrb[10].mxu0 }
 0x420   : > { %v1941_v30 = vpop.f32.mrb[11].mxu0  ;;  %v1947_v31 = vpop.f32.mrb[11].mxu1  ;;  %v2128_v28 = vld [vmem:[#allocation11] sm:$0xff]  }
 0x425   : > { %v1141_v32 = vpop.f32.mrb[12].mxu0 }
 0x426   : > { %v1952_v33 = vpop.f32.mrb[13].mxu0  ;;  %v1156_v34 = vsel %vm962_vm3, %v1141_v32, -inf }
 0x427   : > { %1157 = vmax.xlane.f32.xlu0 %v1156_v34  ;;  %v1144_v35 = vpop.f32.mrb[14].mxu0 }
 0x428   : > { %v1953_v36 = vpop.f32.mrb[15].mxu0 }
 0x430   : > { %819 = vrot.lane.b32.xlu1 %v2745_v48, %s2399_s19  ;;  %s620_s19 = scalar_lea.vmem [#allocation15], %s1814_s6 }
 0x434   : > { %829 = vrot.lane.b32.xlu1 %v2745_v48, %s2401_s12  ;;  %s2983_s12 = sld [smem:[#allocation34_spill]] }
 0x439   : > { %v1149_v37 = vpop.xlane.xlu0 %1148 }
 0x43a   : > { %v1159_v38 = vsub.f32 %v1003_v17, %v1149_v37 }
 0x43c   : > { %v1163_v39 = vmul.f32 1.442695, %v1159_v38 }
 0x43d   : > { %809 = vrot.lane.b32.xlu0 %v2745_v48, %s2400_s30  ;;  %s1679_s30 = sshll.u32 %s620_s19, 4  ;;  %s2874_s30 = int_to_ptr.vmem [resolvable:$true] %s1679_s30 }
 0x43e   : > { %2140 = vpow2.f32 %v1163_v39 }
 0x448   : > { %v2141_v40 = vpop.eup %2140 }
 0x449   : > { %v1183_v41 = vpack.c.bf16 %v2141_v40, %v2141_v40  ;;  %v1171_v5 = vsel %vm962_vm3, %v2141_v40, 0.0 }
 0x44b   : > { %1957 = vmatmul.mubr.msk.bf16.vlgmr.msra.gmra.mrb[12].mxu1 %vm962_vm3, %v1183_v41 }
 0x44c   : > { %1968 = vmatprep.mubr.msk.bf16.mxu1 %vm2398_vm1, %v2397_v14 }
 0x4ac   : > { %v1155_v42 = vpop.xlane.xlu0 %1154  ;;  %v1152_v43 = vpop.xlane.xlu1 %1151 }
 0x4ad   : > { %v1161_v44 = vsub.f32 %v1095_v23, %v1155_v42  ;;  %v1160_v45 = vsub.f32 %v1049_v22, %v1152_v43 }
 0x4af   : > { %v1167_v46 = vmul.f32 1.442695, %v1161_v44  ;;  %v1165_v47 = vmul.f32 1.442695, %v1160_v45 }
 0x4b0   : > { %v820_v49 = vpop.permute.xlu1 %819 }
 0x4b1   : > { %2142 = vpow2.f32 %v1167_v46  ;;  %823 = vst.msk [vmem:[#allocation3 + $0x8] sm:$0xf] %vm794_vm2, %v820_v49  ;;  %v1842_v46 = vld [vmem:[#allocation12] ss:$0 sm:$0xff] }
 0x4b2   : > { %2144 = vpow2.f32 %v1165_v47 }
 0x4b4   : > { %v830_v48 = vpop.permute.xlu1 %829  ;;  %v1158_v50 = vpop.xlane.xlu0 %1157 }
 0x4b5   : > { %833 = vst.msk [vmem:[#allocation3 + $0xc] sm:$0xf] %vm794_vm2, %v830_v48  ;;  %v1162_v51 = vsub.f32 %v1141_v32, %v1158_v50  ;;  %v2129_v32 = vld [vmem:[#allocation11 + $0x8] sm:$0xff]  }
 0x4b7   : > { %v1169_v52 = vmul.f32 1.442695, %v1162_v51 }
 0x4b8   : > { %v810_v53 = vpop.permute.xlu0 %809  ;;  %v1189_v54 = vld [vmem:[#allocation3 + $0x8] sm:$0xf] }
 0x4b9   : > { %2146 = vpow2.f32 %v1169_v52  ;;  %813 = vst.msk [vmem:[#allocation3 + $0x4] sm:$0xf] %vm794_vm2, %v810_v53  ;;  %v1288_v55 = vsel %vm1194_vm4, %v1189_v54, 0 }
 0x4ba   : > { %1967 = vmatpush3.bf16.msra.mxu1 %v1288_v55 }
 0x4bb   : > { %v2143_v56 = vpop.eup %2142  ;;  %1978 = vmatprep.subr.bf16.mxu1 %v2397_v14 }
 0x4bc   : > { %v2145_v57 = vpop.eup %2144  ;;  %v1177_v58 = vsel %vm962_vm3, %v2143_v56, 0.0  ;;  %v1185_v59 = vpack.c.bf16 %v2143_v56, %v2143_v56  ;;  %v1190_v63 = vld [vmem:[#allocation3 + $0xc] sm:$0xf] }
 0x4bd   : > { %v1174_v60 = vsel %vm962_vm3, %v2145_v57, 0.0  ;;  %1178 = vadd.xlane.f32.xlu0 %v1177_v58  ;;  %v1184_v2 = vpack.c.bf16 %v2145_v57, %v2145_v57  ;;  %v1334_v4 = vsel %vm1194_vm4, %v1190_v63, 0 }
 0x4be   : > { %1175 = vadd.xlane.f32.xlu1 %v1174_v60  ;;  %1969 = vmatmul.mubr.msk.bf16.vlgmr.msra.gmra.mrb[16].mxu1 %vm962_vm3, %v1185_v59  ;;  %v2130_v59 = vld [vmem:[%s2931_s11] sm:$0xff]  }
 0x4bf   : > { %1982 = vmatprep.mubr.msk.bf16.mxu1 %vm2398_vm1, %v2397_v14  ;;  %1979 = vmatpush3.bf16.msra.mxu1 %v2128_v28  ;;  %v2132_v60 = vld [vmem:[%s2933_s13] sm:$0xff]  }
 0x4c0   : > { %v1188_v61 = vld [vmem:[#allocation3 + $0x4] sm:$0xf]  ;;  %1980 = vmatprep.subr.bf16.mxu1 %v2397_v14 }
 0x4c1   : > { %v1242_v62 = vsel %vm1194_vm4, %v1188_v61, 0  ;;  %v2133_v61 = vld [vmem:[%s2933_s13 + $0x8] sm:$0xff]  }
 0x4c2   : > { %1961 = vmatpush3.bf16.msra.mxu0 %v1242_v62 }
 0x4c3   : > { %v2147_v1 = vpop.eup %2146  ;;  %1972 = vmatprep.subr.bf16.mxu0 %v2397_v14  ;;  %1981 = vmatpush3.bf16.msra.mxu1 %v2129_v32 }
 0x4c4   : > { %v1180_v3 = vsel %vm962_vm3, %v2147_v1, 0.0  ;;  %v1186_v6 = vpack.c.bf16 %v2147_v1, %v2147_v1  ;;  %1994 = vmatprep.subr.bf16.mxu1 %v2397_v14 }
 0x4c5   : > { %1181 = vadd.xlane.f32.xlu0 %v1180_v3  ;;  %1963 = vmatmul.mubr.msk.bf16.vlgmr.msra.gmra.mrb[16].mxu0 %vm962_vm3, %v1184_v2  ;;  %v1846_v3 = vld [vmem:[%s2935_s15] ss:$0 sm:$0xff] }
 0x4c6   : > { %1973 = vmatpush3.bf16.msra.mxu0 %v1334_v4  ;;  %1974 = vmatprep.mubr.msk.bf16.mxu0 %vm2398_vm1, %v2397_v14 }
 0x4c7   : > { %1986 = vmatprep.subr.bf16.mxu0 %v2397_v14 }
 0x4c9   : > { %1172 = vadd.xlane.f32.xlu0 %v1171_v5  ;;  %v1847_v5 = vld [vmem:[%s2936_s16] ss:$0 sm:$0xff] }
 0x4cd   : > { %1975 = vmatmul.mubr.msk.bf16.vlgmr.msra.gmra.mrb[20].mxu0 %vm962_vm3, %v1186_v6 }
 0x4ce   : > { %1990 = vmatprep.mubr.msk.bf16.mxu0 %vm2398_vm1, %v2397_v14  ;;  %1987 = vmatpush3.bf16.msra.mxu0 %v2130_v59 }
 0x4cf   : > { %1988 = vmatprep.subr.bf16.mxu0 %v2397_v14 }
 0x51e   : > { %v1232_v7 = vpop.f32.mrb[12].mxu1 }
 0x51f   : > { %v1958_v8 = vpop.f32.mrb[13].mxu1 }
 0x520   : > { %v1235_v9 = vpop.f32.mrb[14].mxu1 }
 0x521   : > { %v1959_v10 = vpop.f32.mrb[15].mxu1  ;;  %v2134_v9 = vld [vmem:[%s2933_s13 + $0x10] sm:$0xff]  }
 0x522   : > { %v2135_v10 = vld [vmem:[%s2933_s13 + $0x18] sm:$0xff]  }
 0x54a   : > { %v1179_v11 = vpop.xlane.xlu0 %1178 }
 0x54b   : > { %v1176_v18 = vpop.xlane.xlu1 %1175 }
 0x552   : > { %v1182_v12 = vpop.xlane.xlu0 %1181 }
 0x556   : > { %v1173_v13 = vpop.xlane.xlu0 %1172 }
 0x557   : > { %2148 = vrcp.f32 %v1173_v13 }
 0x558   : > { %2150 = vrcp.f32 %v1179_v11  ;;  %v1848_v11 = vld [vmem:[%s2980_s14] ss:$0 sm:$0xff] }
 0x559   : > { %2152 = vrcp.f32 %v1176_v18 }
 0x55a   : > { %2154 = vrcp.f32 %v1182_v12 }
 0x561   : > { %v2149_v15 = vpop.eup %2148 }
 0x562   : > { %v1380_v16 = vmul.f32 %v2149_v15, %v1232_v7  ;;  %v2151_v19 = vpop.eup %2150 }
 0x563   : > { %v2153_v26 = vpop.eup %2152 }
 0x564   : > { %v1384_v17 = vpack.c.bf16 %v1380_v16, %v1380_v16  ;;  %v2155_v35 = vpop.eup %2154 }
 0x566   : > { %1388 = vst.msk [vmem:[#allocation5] sm:$0xf] %vm794_vm2, %v1384_v17 }
 0x591   : > { %v1324_v20 = vpop.f32.mrb[16].mxu1 }
 0x592   : > { %v1382_v21 = vmul.f32 %v2151_v19, %v1324_v20  ;;  %v1970_v22 = vpop.f32.mrb[17].mxu1 }
 0x593   : > { %v1327_v23 = vpop.f32.mrb[18].mxu1 }
 0x594   : > { %v1866_v24 = vpack.c.bf16 %v1382_v21, %v1382_v21  ;;  %v1971_v25 = vpop.f32.mrb[19].mxu1 }
 0x596   : > { %1400 = vrot.lane.b32.xlu0 %v1866_v24, %s2402_s24  ;;  %s2872_s24 = scalar_lea.hbm %s2983_s12, %s1859_s23 }
 0x598   : > { %v1278_v27 = vpop.f32.mrb[16].mxu0 }
 0x599   : > { %v1381_v29 = vmul.f32 %v2153_v26, %v1278_v27  ;;  %v1964_v30 = vpop.f32.mrb[17].mxu0 }
 0x59a   : > { %v1281_v31 = vpop.f32.mrb[18].mxu0 }
 0x59b   : > { %v1865_v33 = vpack.c.bf16 %v1381_v29, %v1381_v29  ;;  %v1965_v34 = vpop.f32.mrb[19].mxu0 }
 0x59d   : > { %1392 = vrot.lane.b32.xlu1 %v1865_v33, %s2403_s26  ;;  %s2298_s26 = scalar_lea.vmem %s2874_s30, 128 }
 0x59e   : > { %p2299_p2 = scmp.ne.s32.totalorder %s2874_s30, %s2298_s26 }
 0x5a0   : > { %v1370_v36 = vpop.f32.mrb[20].mxu0  ;;  %p2300_p8 = pnand %p2299_p2, %p2984_p4 }
 0x5a1   : > { %v1383_v37 = vmul.f32 %v2155_v35, %v1370_v36  ;;  %v1976_v38 = vpop.f32.mrb[21].mxu0 }
 0x5a2   : > { %v1373_v39 = vpop.f32.mrb[22].mxu0  ;;  %p2301_p10 = pneg %p2300_p8 }
 0x5a3   : > { %v1867_v40 = vpack.c.bf16 %v1383_v37, %v1383_v37  ;;  %v1977_v41 = vpop.f32.mrb[23].mxu0 }
 0x5a5   : > { %1408 = vrot.lane.b32.xlu1 %v1867_v40, %s2404_s22  ;;  %s2405_s22 = smov [#allocation15]  }
 0x5a6   : > { %s2302_s20 = sshll.u32 %s2405_s22, 4  ;;  %s2303_s20 = int_to_ptr.vmem [resolvable:$false] %s2302_s20 }
 0x5a7   : > { %s2304_s14 = scalar_lea.vmem %s2303_s20, 256  ;;  %p2305_p11 = scmp.lt.s32.totalorder %s2874_s30, %s2303_s20 }
 0x5a8   : > { %p2306_p3 = scmp.lt.s32.totalorder %s2304_s14, %s2298_s26 }
 0x5aa   : > { %p2307_p5 = por %p2306_p3, %p2305_p11 }
 0x5ac   : > { %p2308_p6 = pnand %p2307_p5, %p2301_p10 }
 0x608   : > { %v1401_v43 = vpop.permute.xlu0 %1400 }
 0x60f   : > { %v1393_v42 = vpop.permute.xlu1 %1392 }
 0x610   : > { %1396 = vst.msk [vmem:[#allocation5] sm:$0xf] %vm1395_vm5, %v1393_v42 }
 0x611   : > { %1404 = vst.msk [vmem:[#allocation5] sm:$0xf] %vm1403_vm6, %v1401_v43 }
 0x617   : > { %v1409_v44 = vpop.permute.xlu1 %1408 }
 0x618   : > { %1412 = vst.msk [vmem:[#allocation5] sm:$0xf] %vm1411_vm7, %v1409_v44 }
 0x61f   : > { %v1413_v45 = vld [vmem:[#allocation5] sm:$0xf] }
 0x620   : > { %1983 = vmatmul.mubr.msk.bf16.vlgmr.msra.gmra.mrb[20].mxu1 %vm634_vm0, %v1413_v45 }
 0x621   : > { %2002 = vmatprep.mubr.msk.bf16.mxu1 %vm2398_vm1, %v2397_v14  ;;  %1995 = vmatpush3.bf16.msra.mxu1 %v2132_v60 }
 0x622   : > { %1996 = vmatprep.subr.bf16.mxu1 %v2397_v14 }
 0x625   : > { %1997 = vmatpush3.bf16.msra.mxu1 %v2133_v61 }
 0x626   : > { %1998 = vmatprep.subr.bf16.mxu1 %v2397_v14 }
 0x629   : > { %1999 = vmatpush3.bf16.msra.mxu1 %v2134_v9 }
 0x62a   : > { %2000 = vmatprep.subr.bf16.mxu1 %v2397_v14  ;;  %v1852_v14 = vld [vmem:[%s2981_s18] ss:$0 sm:$0xff] }
 0x62d   : > { %2001 = vmatpush3.bf16.msra.mxu1 %v2135_v10 }
 0x6f3   : > { %v1474_v47 = vpop.f32.mrb[20].mxu1 }
 0x6f4   : > { %v1475_v49 = vadd.f32 %v1842_v46, %v1474_v47  ;;  %v1984_v48 = vpop.f32.mrb[21].mxu1 }
 0x6f5   : > { %v1477_v50 = vpop.f32.mrb[22].mxu1 }
 0x6f6   : > { %v1480_v51 = vadd.f32 %v1475_v49, %v2698_v0  ;;  %v1985_v52 = vpop.f32.mrb[23].mxu1  ;;  %v2131_v0 = vld [vmem:[%s2931_s11 + $0x8] sm:$0xff]  }
 0x6f7   : > { %1989 = vmatpush3.bf16.msra.mxu0 %v2131_v0 }
 0x6f8   : > { %v1483_v53 = vsel %vm634_vm0, %v1480_v51, 0.0 }
 0x6f9   : > { %1484 = vadd.xlane.f32.xlu1 %v1483_v53 }
 0x786   : > { %v1485_v54 = vpop.xlane.xlu1 %1484 }
 0x787   : > { %v1486_v55 = vmul.f32 0.03125, %v1485_v54 }
 0x789   : > { %v1487_v56 = vsub.f32 %v1480_v51, %v1486_v55 }
 0x78b   : > { %v1488_v57 = vmul.f32 %v1487_v56, %v1487_v56 }
 0x78d   : > { %v1489_v58 = vsel %vm634_vm0, %v1488_v57, 0.0 }
 0x78e   : > { %1490 = vadd.xlane.f32.xlu0 %v1489_v58 }
 0x81b   : > { %v1491_v62 = vpop.xlane.xlu0 %1490 }
 0x81c   : > { %v1492_v63 = vmul.f32 0.03125, %v1491_v62 }
 0x81e   : > { %v1493_v1 = vadd.f32 1e-05, %v1492_v63 }
 0x820   : > { %2156 = vrsqrt.f32 %v1493_v1 }
 0x82a   : > { %v2157_v2 = vpop.eup %2156 }
 0x82b   : > { %v1495_v4 = vmul.f32 %v2157_v2, %v1487_v56 }
 0x82d   : > { %v1502_v6 = vmul.f32 %v1846_v3, %v1495_v4 }
 0x82f   : > { %v1509_v7 = vadd.f32 %v1847_v5, %v1502_v6 }
 0x831   : > { %v1510_v8 = vpack.c.bf16 %v1509_v7, %v1509_v7 }
 0x833   : > { %1991 = vmatmul.mubr.msk.bf16.vlgmr.msra.gmra.mrb[24].mxu0 %vm634_vm0, %v1510_v8 }
 0x906   : > { %v1571_v12 = vpop.f32.mrb[24].mxu0 }
 0x907   : > { %v1572_v13 = vadd.f32 %v1848_v11, %v1571_v12  ;;  %v1992_v15 = vpop.f32.mrb[25].mxu0 }
 0x908   : > { %v1574_v16 = vpop.f32.mrb[26].mxu0 }
 0x909   : > { %v1577_v17 = vmax.f32 %v1572_v13, 0.0  ;;  %v1993_v18 = vpop.f32.mrb[27].mxu0 }
 0x90b   : > { %v1578_v19 = vpack.c.bf16 %v1577_v17, %v1577_v17 }
 0x90d   : > { %2003 = vmatmul.mubr.msk.bf16.vlgmr.msra.gmra.mrb[24].mxu1 %vm1618_vm8, %v1578_v19 }
 0x9e0   : > { %v1656_v20 = vpop.f32.mrb[24].mxu1 }
 0x9e1   : > { %v1657_v21 = vadd.f32 %v1852_v14, %v1656_v20  ;;  %v2004_v22 = vpop.f32.mrb[25].mxu1 }
 0x9e2   : > { %v1659_v23 = vpop.f32.mrb[26].mxu1 }
 0x9e3   : > { %v1662_v24 = vadd.f32 %v1657_v21, %v1480_v51  ;;  %v2005_v25 = vpop.f32.mrb[27].mxu1 }
 0x9e5   : > { %1663 = vst.msk [vmem:[%s620_s19] sm:$0xff] %vm634_vm0, %v1662_v24 }
 0x9e6   : > { %2311 = shalt.err (!%p2308_p6)
}
 0x9e7   : > { %s2312_s28 = scalar_lea.hbm %s2872_s24, 128  ;;  %s2316_s21 = scalar_lea.hbm %s2983_s12, 256 }
 0x9e8   : > { %p2313_p7 = scmp.ne.s32.totalorder %s2872_s24, %s2312_s28  ;;  %p2317_p0 = scmp.lt.u32.totalorder %s2872_s24, %s2983_s12 }
 0x9e9   : > { %p2318_p1 = scmp.lt.u32.totalorder %s2316_s21, %s2312_s28  ;;  %p2320_p2 = scmp.lt.u32.totalorder %s2312_s28, %s2872_s24 }
 0x9ea   : > { %p2314_p9 = pnand %p2313_p7, %p2984_p4 }
 0x9eb   : > { %p2319_p13 = por %p2318_p1, %p2317_p0 }
 0x9ec   : > { %p2315_p12 = pneg %p2314_p9 }
 0x9ed   : > { %p2321_p8 = por %p2320_p2, %p2319_p13 }
 0x9ef   : > { %p2322_p10 = pnand %p2321_p8, %p2315_p12 }
 0x9f1   : > { %2325 = shalt.err (!%p2322_p10)
}
 0x9f2   : > { %2026 = dma.vmem_to_hbm [thread:$0]  (%p2984_p4), %s2874_s30, 128, %s2872_s24, %s1665_s27  }
 0x9f3 PF: > { %s2985_s19 = sld [smem:[#allocation23_spill]]  ;;  %s2986_s29 = sld [smem:[#allocation20_spill]] }
 0x9f4   : > { %s2987_s8 = sld [smem:[#allocation26_spill]] }
 0x9f9   : > { %p2058_p11 = scmp.ge.s32.totalorder %s2985_s19, 2  ;;  %s1691_s26 = sand.u32 1, %s2986_s29  }
 0x9fa   : > { %p2988_p3 = scmp.ne.s32.totalorder %s2987_s8, 0  ;;  %s1692_s22 = scalar_lea.sflag [#allocation8], %s1691_s26 }
 0x9fc   : > { %p2045_p5 = pnand %p2058_p11, %p2988_p3 }
 0x9fe   : > { %2363 = dma.done.wait (!%p2045_p5), %s1692_s22, 128  }
 0x9ff   : > { %2365 = vsyncadd (!%p2045_p5), %s1692_s22, 4294967168  ;;  %s33_s29 = sadd.s32 1, %s2985_s19   ;;  %s2989_s20 = sld [smem:[#allocation21_spill]] }
 0xa00   : > { %p30_p6 = scmp.ge.s32.totalorder %s33_s29, 4   ;;  %s2990_s26 = sld [smem:[#allocation27_spill]] }
 0xa01   : > { %s2991_s27 = sld [smem:[#allocation22_spill]]  ;;  %s2992_s28 = sld [smem:[#allocation24_spill]] }
 0xa02   : > { %s2993_s24 = smov %s2372_s25  ;;  %32 = sbr.rel (!%p30_p6) target bundleno = 15 (0xf), region = 158 }
 0xa05   : > { %s2994_s25 = smov %s2989_s20 }
 0xa09   :  { %1697 = vsyncpa [#allocation7], 1 }
 0xa0a   :  { %1699 = vsyncpa [#allocation7 + $0x1], 1 }
 0xa0b   :  { %1700 = vsyncpa [#allocation10], 1 }
 0xa0c   :  { %1701 = vsyncpa [#allocation13], 1 }
 0xa0d   :  { %1702 = vsyncpa [#allocation8], 1 }
 0xa0e   :  { %1704 = vsyncpa [#allocation8 + $0x1], 1 }

</bundles_post_ra>
